<compile_context>
chip_gen: v5e
topology: v5e:2x2
jax: 0.10.0
libtpu: 0.0.40
codegen_flags: <defaults>
</compile_context>

<pallas_src>
import functools

import jax
import jax.numpy as jnp
import numpy as np
from jax.experimental import pallas as pl
from jax.experimental.pallas import tpu as pltpu


def _lspm_kernel(x_ref, convw_ref, gapw_ref, poolt_ref, o_ref,
                 xbf_ref, xconv_ref, mm2_ref, *, tile_i):
    # x_ref:     (1, C, HW) f32   input batch slice (resident across row-blocks)
    # convw_ref: (SS, C)    f32   1x1 conv weight (C -> S*S), no bias
    # gapw_ref:  (C, C)     f32   GAP 1x1 conv weight (C -> C), no bias
    # poolt_ref: (SS, HW)   f32   transposed adaptive-avg-pool matrix (lane-dense)
    # o_ref:     (1, C, HW) f32   output batch slice
    # xbf_ref:   (C, HW)    bf16  scratch: x cast once per batch
    # xconv_ref: (SS, HW)   bf16  scratch: 1x1 conv output
    # mm2_ref:   (SS, HW)   f32   scratch: MM2 accumulator
    i = pl.program_id(1)
    n_i = pl.num_programs(1)

    # ---- per-batch init (first row-block only) -------------------------------
    @pl.when(i == 0)
    def _init():
        x_bf = x_ref[0].astype(jnp.bfloat16)                           # (C, HW)
        xbf_ref[...] = x_bf
        # 1x1 conv C -> SS as a channel matmul (bf16 MXU, f32 accumulate).
        xconv_ref[...] = jnp.dot(
            convw_ref[...].astype(jnp.bfloat16), x_bf,
            preferred_element_type=jnp.float32).astype(jnp.bfloat16)   # (SS, HW)
        mm2_ref[...] = jnp.zeros_like(mm2_ref)

    # ---- one row-block of the Gram matrix + online accumulation into MM2 -----
    start = pl.multiple_of(i * tile_i, tile_i)
    x_blk = xbf_ref[:, pl.ds(start, tile_i)]                           # (C, T) bf16
    # s[r, j] = sum_c x[c, start + r] * x[c, j]  (contract channels; bf16 MXU)
    s = jax.lax.dot_general(
        x_blk, xbf_ref[...], (((0,), (0,)), ((), ())),
        preferred_element_type=jnp.float32)                            # (T, HW) f32
    # Row-wise softmax in f32; divide replaced by EUP reciprocal + multiply.
    m = jnp.max(s, axis=-1, keepdims=True)                             # (T, 1)
    p = jnp.exp(s - m)                                                 # (T, HW) f32
    inv_l = pl.reciprocal(jnp.sum(p, axis=-1, keepdims=True), approx=True)
    p_bf = (p * inv_l).astype(jnp.bfloat16)                            # (T, HW) bf16
    # MM2 += x_conv[:, block] @ softmax_block     (SS, T) @ (T, HW) -> (SS, HW)
    xconv_blk = xconv_ref[:, pl.ds(start, tile_i)]                     # (SS, T) bf16
    mm2_ref[...] += jnp.dot(xconv_blk, p_bf, preferred_element_type=jnp.float32)

    # ---- final row-block: GAP branch, MM3 and residual add -------------------
    @pl.when(i == n_i - 1)
    def _finalize():
        x = x_ref[0]                                                   # (C, HW) f32
        # adaptive_avg_pool2d(x, S): contract HW of x with HW of pool^T.
        pooled = jax.lax.dot_general(
            x, poolt_ref[...], (((1,), (1,)), ((), ())),
            preferred_element_type=jnp.float32)                        # (C, SS)
        gap = jnp.dot(gapw_ref[...], pooled,
                      preferred_element_type=jnp.float32)              # (C, SS)
        gap = jnp.maximum(gap, 0.0)
        mm3 = jnp.dot(gap.astype(jnp.bfloat16),
                      mm2_ref[...].astype(jnp.bfloat16),
                      preferred_element_type=jnp.float32)              # (C, HW)
        o_ref[0] = mm3 + x


@functools.lru_cache(maxsize=None)
def _adaptive_pool_matrix_np(H, W, S):
    """(H*W, S*S) matrix P with x_flat(C,HW) @ P == adaptive_avg_pool2d(x, S) flat."""
    P = np.zeros((H * W, S * S), dtype=np.float32)
    for si in range(S):
        h0, h1 = (si * H) // S, -((-(si + 1) * H) // S)   # floor / ceil (torch semantics)
        for sj in range(S):
            w0, w1 = (sj * W) // S, -((-(sj + 1) * W) // S)
            cnt = (h1 - h0) * (w1 - w0)
            for h in range(h0, h1):
                for w in range(w0, w1):
                    P[h * W + w, si * S + sj] = 1.0 / cnt
    return P


def _pick_row_tile(HW, budget_bytes=4 << 20):
    """Largest multiple-of-128 row tile dividing HW with a bounded f32 footprint."""
    for t in (1024, 512, 256, 128):
        if HW % t == 0 and t * HW * 4 <= budget_bytes:
            return t
    return 128


@functools.partial(jax.jit, static_argnames=("S",))
def lspm_forward(x, conv_w, gap_w, S):
    """x: (B, C, H, W) f32.  conv_w: (S*S, C).  gap_w: (C, C)."""
    B, C, H, W = x.shape
    HW = H * W
    SS = S * S
    assert HW % 128 == 0, "H*W must be a multiple of 128 (keep the lane dim dense)"

    # Pad channels to a multiple of 8 (sublane alignment).  Zero channels are a
    # semantic no-op for every branch of this layer (verified: Gram, conv, GAP,
    # residual all get exact zeros in the padded rows), and are sliced off below.
    Cp = max(8, ((C + 7) // 8) * 8)
    if Cp != C:
        x = jnp.pad(x, ((0, 0), (0, Cp - C), (0, 0), (0, 0)))
        conv_w = jnp.pad(conv_w, ((0, 0), (0, Cp - C)))
        gap_w = jnp.pad(gap_w, ((0, Cp - C), (0, Cp - C)))

    # Pool matrix stored transposed -> (SS, HW): lane dim is HW (dense in VMEM).
    pool_t = jnp.asarray(_adaptive_pool_matrix_np(H, W, S).T)
    x_flat = x.reshape(B, Cp, HW)

    tile_i = _pick_row_tile(HW)
    n_i = HW // tile_i

    # Rough VMEM budget: double-buffered in/out blocks + resident weights +
    # scratch + live (tile, HW) softmax temporaries.  Capped at 48 MiB so it is
    # safe on v7x (64 MiB physical) as well as v5e/v6e (128 MiB).
    est = (2 * Cp * HW * 4                     # x block, double-buffered
           + 2 * Cp * HW * 4                   # out block, double-buffered
           + 2 * (SS * Cp + Cp * Cp + SS * HW) * 4   # weights + pool^T
           + Cp * HW * 2 + SS * HW * 2 + SS * HW * 4  # scratch
           + 3 * tile_i * HW * 4)              # s, p and temporaries
    vmem_limit = int(min(max(est + (4 << 20), 16 << 20), 48 << 20))

    flops = int(B * (2 * HW * HW * Cp + 2 * SS * HW * HW + 2 * Cp * SS * HW))
    cost = pl.CostEstimate(flops=flops,
                           transcendentals=int(B * HW * HW),
                           bytes_accessed=int(2 * B * Cp * HW * 4))

    kernel = functools.partial(_lspm_kernel, tile_i=tile_i)

    out_flat = pl.pallas_call(
        kernel,
        out_shape=jax.ShapeDtypeStruct((B, Cp, HW), jnp.float32),
        grid_spec=pltpu.PrefetchScalarGridSpec(
            num_scalar_prefetch=0,
            grid=(B, n_i),
            in_specs=[
                pl.BlockSpec((1, Cp, HW), lambda b, i: (b, 0, 0)),
                pl.BlockSpec((SS, Cp), lambda b, i: (0, 0)),
                pl.BlockSpec((Cp, Cp), lambda b, i: (0, 0)),
                pl.BlockSpec((SS, HW), lambda b, i: (0, 0)),
            ],
            out_specs=pl.BlockSpec((1, Cp, HW), lambda b, i: (b, 0, 0)),
            scratch_shapes=[
                pltpu.VMEM((Cp, HW), jnp.bfloat16),   # x cast once per batch
                pltpu.VMEM((SS, HW), jnp.bfloat16),   # 1x1-conv output
                pltpu.VMEM((SS, HW), jnp.float32),    # MM2 accumulator
            ],
        ),
        compiler_params=pltpu.CompilerParams(
            dimension_semantics=("parallel", "arbitrary"),
            vmem_limit_bytes=vmem_limit,
        ),
        cost_estimate=cost,
    )(x_flat, conv_w, gap_w, pool_t)

    return out_flat[:, :C, :].reshape(B, C, H, W)


def lspm_reference(x, conv_w, gap_w, S):
    """Pure-JAX f32 reference mirroring the PyTorch forward."""
    B, C, H, W = x.shape
    HW = H * W
    x_r = x.reshape(B, C, HW)                                    # (B, C, HW)
    mm1 = jnp.einsum("bci,bcj->bij", x_r, x_r)                   # (B, HW, HW)
    mm1 = jax.nn.softmax(mm1, axis=-1)
    x_conv = jnp.einsum("oc,bci->boi", conv_w, x_r)              # (B, SS, HW)
    mm2 = jnp.einsum("boi,bij->boj", x_conv, mm1)                # (B, SS, HW)
    pool = jnp.asarray(_adaptive_pool_matrix_np(H, W, S))        # (HW, SS)
    gap = jnp.einsum("bci,is->bcs", x_r, pool)                   # (B, C, SS)
    gap = jnp.maximum(jnp.einsum("dc,bcs->bds", gap_w, gap), 0.0)
    mm3 = jnp.einsum("bcs,bsj->bcj", gap, mm2)                   # (B, C, HW)
    return (mm3 + x_r).reshape(B, C, H, W)


if __name__ == "__main__":
    B, C, H, W = 2, 4, 16, 16
    S = 2
    SS = S * S

    key = jax.random.PRNGKey(0)
    kx, kc, kg = jax.random.split(key, 3)

    x = jax.random.normal(kx, (B, C, H, W), dtype=jnp.float32)
    # 1x1 conv weights, torch shapes (SS, C, 1, 1) / (C, C, 1, 1) squeezed.
    conv_w = jax.random.normal(kc, (SS, C), dtype=jnp.float32) * 0.1
    gap_w = jax.random.normal(kg, (C, C), dtype=jnp.float32) * 0.1

    out = jax.block_until_ready(lspm_forward(x, conv_w, gap_w, S))
    ref = lspm_reference(x, conv_w, gap_w, S)

    # bf16 MXU operands with f32 accumulation -> loosened tolerance vs f32 ref.
    np.testing.assert_allclose(np.asarray(out), np.asarray(ref), rtol=1e-2, atol=1e-2)

    print("KERNEL_OK")
</pallas_src>

<mosaic_0001>
module attributes {stable_mosaic.version = 11 : i64} {
  func.func @_lspm_kernel(%arg0: i32, %arg1: i32, %arg2: memref<1x8x256xf32, #tpu.memory_space<vmem>>, %arg3: memref<4x8xf32, #tpu.memory_space<vmem>>, %arg4: memref<8x8xf32, #tpu.memory_space<vmem>>, %arg5: memref<4x256xf32, #tpu.memory_space<vmem>>, %arg6: memref<1x8x256xf32, #tpu.memory_space<vmem>>, %arg7: memref<8x256xbf16, #tpu.memory_space<vmem>>, %arg8: memref<4x256xbf16, #tpu.memory_space<vmem>>, %arg9: memref<4x256xf32, #tpu.memory_space<vmem>>) attributes {dimension_semantics = [#tpu.dimension_semantics<parallel>, #tpu.dimension_semantics<arbitrary>], iteration_bounds = array<i64: 2, 1>, scalar_prefetch = 0 : i64, scratch_operands = 3 : i64, tpu.core_type = #tpu.core_type<tc>, window_params = [{transform_indices = @transform_0, window_bounds = array<i64: 1, 8, 256>}, {pipeline_mode = #tpu.pipeline_mode<synchronous>, transform_indices = @transform_1, window_bounds = array<i64: 4, 8>}, {pipeline_mode = #tpu.pipeline_mode<synchronous>, transform_indices = @transform_2, window_bounds = array<i64: 8, 8>}, {pipeline_mode = #tpu.pipeline_mode<synchronous>, transform_indices = @transform_3, window_bounds = array<i64: 4, 256>}, {transform_indices = @transform_4, window_bounds = array<i64: 1, 8, 256>}]} {
    %c0_i32 = arith.constant 0 : i32
    %0 = arith.cmpi eq, %arg1, %c0_i32 : i32
    %1 = arith.extui %0 : i1 to i32
    %c0_i32_0 = arith.constant 0 : i32
    %2 = arith.cmpi ne, %1, %c0_i32_0 : i32
    scf.if %2 {
      %c0_13 = arith.constant 0 : index
      %c0_14 = arith.constant 0 : index
      %c0_15 = arith.constant 0 : index
      %29 = vector.load %arg2[%c0_13, %c0_14, %c0_15] : memref<1x8x256xf32, #tpu.memory_space<vmem>>, vector<1x8x256xf32>
      %30 = vector.shape_cast %29 : vector<1x8x256xf32> to vector<8x256xf32>
      %31 = arith.truncf %30 : vector<8x256xf32> to vector<8x256xbf16>
      %c0_16 = arith.constant 0 : index
      %c0_17 = arith.constant 0 : index
      %32 = vector.load %arg7[%c0_16, %c0_17] : memref<8x256xbf16, #tpu.memory_space<vmem>>, vector<8x256xbf16>
      tpu.vector_store %arg7[%c0_16, %c0_17], %31 {strides = array<i32>} : memref<8x256xbf16, #tpu.memory_space<vmem>>, vector<8x256xbf16>,
      %c0_18 = arith.constant 0 : index
      %c0_19 = arith.constant 0 : index
      %33 = vector.load %arg3[%c0_18, %c0_19] : memref<4x8xf32, #tpu.memory_space<vmem>>, vector<4x8xf32>
      %34 = arith.truncf %33 : vector<4x8xf32> to vector<4x8xbf16>
      %cst_20 = arith.constant dense<0.000000e+00> : vector<4x256xf32>
      %35 = tpu.matmul %34, %31, %cst_20 {dimension_numbers = #tpu.dot_dimension_numbers<[1], [0], [0], [1], [0, 0, 1, 1], [], []>} : vector<4x8xbf16>, vector<8x256xbf16>, vector<4x256xf32> -> vector<4x256xf32>
      %36 = arith.truncf %35 : vector<4x256xf32> to vector<4x256xbf16>
      %c0_21 = arith.constant 0 : index
      %c0_22 = arith.constant 0 : index
      %37 = vector.load %arg8[%c0_21, %c0_22] : memref<4x256xbf16, #tpu.memory_space<vmem>>, vector<4x256xbf16>
      tpu.vector_store %arg8[%c0_21, %c0_22], %36 {strides = array<i32>} : memref<4x256xbf16, #tpu.memory_space<vmem>>, vector<4x256xbf16>,
      %cst_23 = arith.constant 0.000000e+00 : f32
      %38 = vector.broadcast %cst_23 : f32 to vector<4x256xf32>
      %c0_24 = arith.constant 0 : index
      %c0_25 = arith.constant 0 : index
      %39 = vector.load %arg9[%c0_24, %c0_25] : memref<4x256xf32, #tpu.memory_space<vmem>>, vector<4x256xf32>
      tpu.vector_store %arg9[%c0_24, %c0_25], %38 {strides = array<i32>} : memref<4x256xf32, #tpu.memory_space<vmem>>, vector<4x256xf32>,
    } else {
    }
    %c256_i32 = arith.constant 256 : i32
    %3 = arith.muli %arg1, %c256_i32 : i32
    %4 = tpu.assume_multiple %3, 256 : i32
    %c0 = arith.constant 0 : index
    %5 = arith.index_cast %4 : i32 to index
    %6 = vector.load %arg7[%c0, %5] : memref<8x256xbf16, #tpu.memory_space<vmem>>, vector<8x256xbf16>
    %c0_1 = arith.constant 0 : index
    %c0_2 = arith.constant 0 : index
    %7 = vector.load %arg7[%c0_1, %c0_2] : memref<8x256xbf16, #tpu.memory_space<vmem>>, vector<8x256xbf16>
    %cst = arith.constant dense<0.000000e+00> : vector<256x256xf32>
    %8 = tpu.matmul %6, %7, %cst {dimension_numbers = #tpu.dot_dimension_numbers<[0], [0], [1], [1], [0, 1, 1, 1], [], []>} : vector<8x256xbf16>, vector<8x256xbf16>, vector<256x256xf32> -> vector<256x256xf32>
    %cst_3 = arith.constant dense<0xFF800000> : vector<256xf32>
    %9 = vector.multi_reduction <maximumf>, %8, %cst_3 [1] : vector<256x256xf32> to vector<256xf32>
    %10 = vector.shape_cast %9 : vector<256xf32> to vector<256x1xf32>
    %11 = vector.broadcast %10 : vector<256x1xf32> to vector<256x256xf32>
    %12 = arith.subf %8, %11 : vector<256x256xf32>
    %13 = math.exp %12 : vector<256x256xf32>
    %cst_4 = arith.constant dense<0.000000e+00> : vector<256xf32>
    %14 = vector.multi_reduction <add>, %13, %cst_4 [1] : vector<256x256xf32> to vector<256xf32>
    %15 = vector.shape_cast %14 : vector<256xf32> to vector<256x1xf32>
    %16 = tpu.reciprocal %15 {approx = true} : vector<256x1xf32> -> vector<256x1xf32>
    %17 = vector.broadcast %16 : vector<256x1xf32> to vector<256x256xf32>
    %18 = arith.mulf %13, %17 : vector<256x256xf32>
    %19 = arith.truncf %18 : vector<256x256xf32> to vector<256x256xbf16>
    %c0_5 = arith.constant 0 : index
    %20 = arith.index_cast %4 : i32 to index
    %21 = vector.load %arg8[%c0_5, %20] : memref<4x256xbf16, #tpu.memory_space<vmem>>, vector<4x256xbf16>
    %c0_6 = arith.constant 0 : index
    %c0_7 = arith.constant 0 : index
    %22 = vector.load %arg9[%c0_6, %c0_7] : memref<4x256xf32, #tpu.memory_space<vmem>>, vector<4x256xf32>
    %cst_8 = arith.constant dense<0.000000e+00> : vector<4x256xf32>
    %23 = tpu.matmul %21, %19, %cst_8 {dimension_numbers = #tpu.dot_dimension_numbers<[1], [0], [0], [1], [0, 0, 1, 1], [], []>} : vector<4x256xbf16>, vector<256x256xbf16>, vector<4x256xf32> -> vector<4x256xf32>
    %24 = arith.addf %22, %23 : vector<4x256xf32>
    %c0_9 = arith.constant 0 : index
    %c0_10 = arith.constant 0 : index
    %25 = vector.load %arg9[%c0_9, %c0_10] : memref<4x256xf32, #tpu.memory_space<vmem>>, vector<4x256xf32>
    tpu.vector_store %arg9[%c0_9, %c0_10], %24 {strides = array<i32>} : memref<4x256xf32, #tpu.memory_space<vmem>>, vector<4x256xf32>,
    %c0_i32_11 = arith.constant 0 : i32
    %26 = arith.cmpi eq, %arg1, %c0_i32_11 : i32
    %27 = arith.extui %26 : i1 to i32
    %c0_i32_12 = arith.constant 0 : i32
    %28 = arith.cmpi ne, %27, %c0_i32_12 : i32
    scf.if %28 {
      %c0_13 = arith.constant 0 : index
      %c0_14 = arith.constant 0 : index
      %c0_15 = arith.constant 0 : index
      %29 = vector.load %arg2[%c0_13, %c0_14, %c0_15] : memref<1x8x256xf32, #tpu.memory_space<vmem>>, vector<1x8x256xf32>
      %30 = vector.shape_cast %29 : vector<1x8x256xf32> to vector<8x256xf32>
      %c0_16 = arith.constant 0 : index
      %c0_17 = arith.constant 0 : index
      %31 = vector.load %arg5[%c0_16, %c0_17] : memref<4x256xf32, #tpu.memory_space<vmem>>, vector<4x256xf32>
      %cst_18 = arith.constant dense<0.000000e+00> : vector<8x4xf32>
      %32 = tpu.matmul %30, %31, %cst_18 {dimension_numbers = #tpu.dot_dimension_numbers<[1], [1], [0], [0], [0, 0, 1, 0], [], []>} : vector<8x256xf32>, vector<4x256xf32>, vector<8x4xf32> -> vector<8x4xf32>
      %c0_19 = arith.constant 0 : index
      %c0_20 = arith.constant 0 : index
      %33 = vector.load %arg4[%c0_19, %c0_20] : memref<8x8xf32, #tpu.memory_space<vmem>>, vector<8x8xf32>
      %cst_21 = arith.constant dense<0.000000e+00> : vector<8x4xf32>
      %34 = tpu.matmul %33, %32, %cst_21 {dimension_numbers = #tpu.dot_dimension_numbers<[1], [0], [0], [1], [0, 0, 1, 1], [], []>} : vector<8x8xf32>, vector<8x4xf32>, vector<8x4xf32> -> vector<8x4xf32>
      %cst_22 = arith.constant 0.000000e+00 : f32
      %35 = vector.broadcast %cst_22 : f32 to vector<8x4xf32>
      %36 = arith.maximumf %34, %35 : vector<8x4xf32>
      %37 = arith.truncf %36 : vector<8x4xf32> to vector<8x4xbf16>
      %c0_23 = arith.constant 0 : index
      %c0_24 = arith.constant 0 : index
      %38 = vector.load %arg9[%c0_23, %c0_24] : memref<4x256xf32, #tpu.memory_space<vmem>>, vector<4x256xf32>
      %39 = arith.truncf %38 : vector<4x256xf32> to vector<4x256xbf16>
      %cst_25 = arith.constant dense<0.000000e+00> : vector<8x256xf32>
      %40 = tpu.matmul %37, %39, %cst_25 {dimension_numbers = #tpu.dot_dimension_numbers<[1], [0], [0], [1], [0, 0, 1, 1], [], []>} : vector<8x4xbf16>, vector<4x256xbf16>, vector<8x256xf32> -> vector<8x256xf32>
      %41 = arith.addf %40, %30 : vector<8x256xf32>
      %c0_26 = arith.constant 0 : index
      %c0_27 = arith.constant 0 : index
      %c0_28 = arith.constant 0 : index
      %42 = vector.load %arg6[%c0_26, %c0_27, %c0_28] : memref<1x8x256xf32, #tpu.memory_space<vmem>>, vector<1x8x256xf32>
      %43 = vector.shape_cast %42 : vector<1x8x256xf32> to vector<8x256xf32>
      %44 = vector.shape_cast %41 : vector<8x256xf32> to vector<1x8x256xf32>
      tpu.vector_store %arg6[%c0_26, %c0_27, %c0_28], %44 {strides = array<i32>} : memref<1x8x256xf32, #tpu.memory_space<vmem>>, vector<1x8x256xf32>,
    } else {
    }
    return
  }
  func.func @transform_0(%arg0: i32, %arg1: i32) -> (i32, i32, i32) {
    %c0_i32 = arith.constant 0 : i32
    %c0_i32_0 = arith.constant 0 : i32
    %c0_i32_1 = arith.constant 0 : i32
    return %arg0, %c0_i32, %c0_i32_0 : i32, i32, i32
  }
  func.func @transform_1(%arg0: i32, %arg1: i32) -> (i32, i32) {
    %c0_i32 = arith.constant 0 : i32
    %c0_i32_0 = arith.constant 0 : i32
    %c0_i32_1 = arith.constant 0 : i32
    return %c0_i32, %c0_i32_0 : i32, i32
  }
  func.func @transform_2(%arg0: i32, %arg1: i32) -> (i32, i32) {
    %c0_i32 = arith.constant 0 : i32
    %c0_i32_0 = arith.constant 0 : i32
    %c0_i32_1 = arith.constant 0 : i32
    return %c0_i32, %c0_i32_0 : i32, i32
  }
  func.func @transform_3(%arg0: i32, %arg1: i32) -> (i32, i32) {
    %c0_i32 = arith.constant 0 : i32
    %c0_i32_0 = arith.constant 0 : i32
    %c0_i32_1 = arith.constant 0 : i32
    return %c0_i32, %c0_i32_0 : i32, i32
  }
  func.func @transform_4(%arg0: i32, %arg1: i32) -> (i32, i32, i32) {
    %c0_i32 = arith.constant 0 : i32
    %c0_i32_0 = arith.constant 0 : i32
    %c0_i32_1 = arith.constant 0 : i32
    return %arg0, %c0_i32, %c0_i32_0 : i32, i32, i32
  }
}

</mosaic_0001>

<bundles_post_ra>
// kernel: lspm_forward.1
= control target key start
LH: loop header
LB: loop body
LE: loop exit
PB: predicated region body
PF: predicated region fallthrough
CT: control target
= control target key end

     0   :  { %s1642_s15 = smov 0   ;;  %s1644_s16 = smov 0   ;;  %s2474_s0 = inlined_call_operand.vmem [shape: f32[2,8,256], index: 0, kind: input, shape index: {}]   ;;  %s2475_s1 = inlined_call_operand.vmem [shape: f32[4,8], index: 1, kind: input, shape index: {}]   ;;  %s2476_s2 = inlined_call_operand.vmem [shape: f32[8,8], index: 2, kind: input, shape index: {}]   ;;  %s2477_s3 = inlined_call_operand.vmem [shape: f32[4,256], index: 3, kind: input, shape index: {}]   ;;  %s2478_s4 = inlined_call_operand.vmem [shape: f32[2,8,256], index: 4, kind: output, shape index: {}]  }
   0x1   :  { %s1646_s17 = smov 0  }
   0x2 LB: > { %s26_s18 = sadd.s32 1, %s1611_s16  ;;  %p1328_p0 = scmp.ge.s32.totalorder %s1615_s17, 1  ;;  %s1615_s17 = sphi %s1646_s17, %s14_s17   ;;  %s1611_s16 = sphi %s1644_s16, %s2560_s16   ;;  %s1607_s15 = sphi %s1642_s15, %s2559_s15  }
   0x3   : > { %p28_p1 = scmp.ge.s32.totalorder %s26_s18, 2  ;;  %p174_p2 = scmp.lt.s32.totalorder %s1615_s17, 3 }
   0x5   : > { %s2562_s18 = smov (%p28_p1, %s26_s18), 0  ;;  %p175_p3 = pnand %p1328_p0, %p174_p2 }
   0x7   : > { %178 = sbr.rel (%p175_p3) target bundleno = 1389 (0x56d), region = 36 }
   0xc   : > { %p200_p4 = scmp.lt.s32.totalorder %s1607_s15, 1  ;;  %vm230_vm0 = vcmask 1043456   ;;  %v219_v5 = vld [vmem:[%s2475_s1] sm:$0xf]  ;;  %vm226_vm1 = vcmask 64512   ;;  %vm266_vm2 = vcmask 1041408  }
   0xd   : > { %v220_v10 = vpack.c.bf16 %v219_v5, %v219_v5  ;;  %vm1218_vm3 = vcmask 31744  }
   0xe   : > { %s2564_s15 = smov (!%p200_p4, %s1607_s15), 1 }
   0xf   : > { %s1372_s19 = sshll.u32 %s2564_s15, 4 }
  0x10   : > { %s1668_s22 = scalar_lea.vmem %s2474_s0, %s1372_s19  ;;  %s209_s5 = scalar_lea.vmem %s2478_s4, %s1372_s19 }
  0x11   : > { %v215_v0 = vld [vmem:[%s1668_s22] sm:$0xff]  ;;  %v216_v1 = vld [vmem:[%s1668_s22 + $0x8] sm:$0xff] }
  0x12   : > { %v217_v2 = vpack.c.bf16 %v216_v1, %v215_v0 }
  0x14   : > { %v222_v3 = vunpack.c.l.b16 %v217_v2  ;;  %v223_v4 = vunpack.c.h.b16 %v217_v2 }
  0x16   : > { %v224_v6 = vpack.c.b16 %v222_v3, %v222_v3  ;;  %v225_v7 = vpack.c.b16 %v223_v4, %v223_v4 }
  0x18   : > { %287 = vxpose.binary.xlu0.c.b16.start.end [1/2] (short) %v225_v7, %v224_v6, 128  ;;  %v232_v8 = vsel %vm230_vm0, %v224_v6, 0  ;;  %v235_v9 = vsel %vm230_vm0, %v225_v7, 0 }
  0x19   : > { %244 = vmatpush.bf16.msra.mxu0 %v232_v8  ;;  %257 = vmatpush.bf16.msra.mxu1 %v235_v9 }
  0x1a   : > { %1374 = vmatpush.bf16.msra.mxu2 %v232_v8  ;;  %1375 = vmatpush.bf16.msra.mxu3 %v235_v9 }
  0x1c   : > { %1333 = vmatmul.msk.bf16.vlgmr.msra.gmra.mxu0 %vm226_vm1, %v220_v10  ;;  %1334 = vmatmul.msk.bf16.vlgmr.msra.gmra.mxu1 %vm226_vm1, %v220_v10 }
  0x1d   : > { %379 = vmatpush.bf16.msrb.mxu1 %v232_v8  ;;  %468 = vmatpush.bf16.msrb.mxu0 %v235_v9 }
  0x99   : > { %v246_v21 = vpop.f32.mrf.mxu0  ;;  %v259_v22 = vpop.f32.mrf.mxu1 }
  0x9a   : > { %v263_v23 = vpack.c.bf16 %v259_v22, %v246_v21 }
  0x9c   : > { %v265_v24 = vrot.slane %v263_v23, 2 }
  0x9e   : > { %v269_v25 = vsel %vm266_vm2, %v263_v23, %v265_v24 }
  0x9f   : > { %271 = vst [vmem:[#allocation3] sm:$0xf] %v269_v25 }
  0xa1   : > { %v248_v27 = vpop.f32.mrf.mxu0  ;;  %v261_v28 = vpop.f32.mrf.mxu1 }
  0xa6   : > { %v1064_v33 = vld [vmem:[#allocation3] sm:$0xf] }
  0xa7   : > { %1067 = vst [vmem:[#allocation1] ss:$4 sm:$0xff] %v1064_v33 }
  0xc4   : > { %v295_v11 = vpop.trf.xlu0 }
  0xc5   : > { %1335 = vmatmul.msk.bf16.vlgmr.msrb.gmra.mxu1 %vm226_vm1, %v295_v11  ;;  %1351 = vmatmul.msk.bf16.vlgmr.msrb.gmra.mxu0 %vm226_vm1, %v295_v11 }
  0xcc   : > { %v296_v12 = vpop.trf.xlu0 }
  0xd4   : > { %v297_v13 = vpop.trf.xlu0 }
  0xd5   : > { %1336 = vmatmul.msk.bf16.gmra.mxu1 %vm226_vm1, %v297_v13  ;;  %1352 = vmatmul.msk.bf16.gmra.mxu0 %vm226_vm1, %v297_v13 }
  0xdc   : > { %v298_v14 = vpop.trf.xlu0 }
  0xe4   : > { %v299_v15 = vpop.trf.xlu0 }
  0xe5   : > { %1337 = vmatmul.msk.bf16.gmra.mxu1 %vm226_vm1, %v299_v15  ;;  %1353 = vmatmul.msk.bf16.gmra.mxu0 %vm226_vm1, %v299_v15 }
  0xec   : > { %v300_v16 = vpop.trf.xlu0 }
  0xf4   : > { %v301_v17 = vpop.trf.xlu0 }
  0xf5   : > { %1338 = vmatmul.msk.bf16.gmra.mxu1 %vm226_vm1, %v301_v17  ;;  %1354 = vmatmul.msk.bf16.gmra.mxu0 %vm226_vm1, %v301_v17 }
  0xfc   : > { %v302_v18 = vpop.trf.xlu0 }
 0x104   : > { %v303_v19 = vpop.trf.xlu0 }
 0x105   : > { %1339 = vmatmul.msk.bf16.vlgmr.msra.gmra.mxu2 %vm226_vm1, %v303_v19  ;;  %1355 = vmatmul.msk.bf16.gmra.mxu0 %vm226_vm1, %v303_v19 }
 0x10c   : > { %v304_v20 = vpop.trf.xlu0 }
 0x114   : > { %v305_v26 = vpop.trf.xlu0 }
 0x115   : > { %1340 = vmatmul.msk.bf16.gmra.mxu2 %vm226_vm1, %v305_v26  ;;  %1356 = vmatmul.msk.bf16.vlgmr.msra.gmra.mxu3 %vm226_vm1, %v305_v26 }
 0x11c   : > { %v306_v29 = vpop.trf.xlu0 }
 0x124   : > { %v307_v30 = vpop.trf.xlu0 }
 0x125   : > { %1341 = vmatmul.msk.bf16.gmra.mxu2 %vm226_vm1, %v307_v30  ;;  %1357 = vmatmul.msk.bf16.gmra.mxu3 %vm226_vm1, %v307_v30 }
 0x12c   : > { %v308_v31 = vpop.trf.xlu0 }
 0x134   : > { %v309_v32 = vpop.trf.xlu0 }
 0x135   : > { %1342 = vmatmul.msk.bf16.gmra.mxu2 %vm226_vm1, %v309_v32  ;;  %1358 = vmatmul.msk.bf16.gmra.mxu3 %vm226_vm1, %v309_v32 }
 0x142   : > { %v1700_v34 = vpop.f32.mrf.mxu0  ;;  %v1710_v37 = vpop.f32.mrf.mxu1 }
 0x143   : > { %2503 = vst [vmem:[#allocation5_spill] sm:$0xff] %v1700_v34 }
 0x144   : > { %2504 = vst [vmem:[#allocation6_spill] sm:$0xff] %v1710_v37 }
 0x145   : > { %1343 = vmatmul.msk.bf16.gmra.mxu2 %vm226_vm1, %v296_v12  ;;  %1359 = vmatmul.msk.bf16.gmra.mxu3 %vm226_vm1, %v296_v12 }
 0x14a   : > { %v1704_v35 = vpop.f32.mrf.mxu0  ;;  %v1718_v40 = vpop.f32.mrf.mxu1 }
 0x14b   : > { %v553_v23 = vmax.f32 %v1718_v40, %v1704_v35 }
 0x152   : > { %v1708_v36 = vpop.f32.mrf.mxu0  ;;  %v1724_v43 = vpop.f32.mrf.mxu1 }
 0x153   : > { %v556_v17 = vmax.f32 %v1724_v43, %v1708_v36 }
 0x155   : > { %1344 = vmatmul.msk.bf16.gmra.mxu2 %vm226_vm1, %v298_v14  ;;  %1360 = vmatmul.msk.bf16.gmra.mxu3 %vm226_vm1, %v298_v14 }
 0x15a   : > { %v1712_v38 = vpop.f32.mrf.mxu0  ;;  %v1734_v47 = vpop.f32.mrf.mxu1 }
 0x15b   : > { %v559_v19 = vmax.f32 %v1734_v47, %v1712_v38 }
 0x162   : > { %v1720_v41 = vpop.f32.mrf.mxu0  ;;  %v1744_v51 = vpop.f32.mrf.mxu1 }
 0x163   : > { %v562_v13 = vmax.f32 %v1744_v51, %v1720_v41 }
 0x165   : > { %1345 = vmatmul.msk.bf16.gmra.mxu2 %vm226_vm1, %v300_v16  ;;  %1361 = vmatmul.msk.bf16.gmra.mxu3 %vm226_vm1, %v300_v16 }
 0x16a   : > { %v1728_v44 = vpop.f32.mrf.mxu0  ;;  %v1762_v60 = vpop.f32.mrf.mxu1 }
 0x16b   : > { %v565_v16 = vmax.f32 %v1762_v60, %v1728_v44 }
 0x172   : > { %v1740_v50 = vpop.f32.mrf.mxu0  ;;  %v1776_v3 = vpop.f32.mrf.mxu1 }
 0x173   : > { %v568_v8 = vmax.f32 %v1776_v3, %v1740_v50 }
 0x175   : > { %1346 = vmatmul.msk.bf16.gmra.mxu2 %vm226_vm1, %v302_v18  ;;  %1362 = vmatmul.msk.bf16.gmra.mxu3 %vm226_vm1, %v302_v18  ;;  %v310_v18 = vpop.trf.xlu0 }
 0x17a   : > { %v1752_v55 = vpop.f32.mrf.mxu0  ;;  %v1788_v9 = vpop.f32.mrf.mxu1 }
 0x17b   : > { %v571_v12 = vmax.f32 %v1788_v9, %v1752_v55 }
 0x182   : > { %v1764_v61 = vpop.f32.mrf.mxu0 }
 0x185   : > { %1347 = vmatmul.msk.bf16.gmra.mxu2 %vm226_vm1, %v304_v20  ;;  %1363 = vmatmul.msk.bf16.gmra.mxu3 %vm226_vm1, %v304_v20  ;;  %v550_v20 = vmax.f32 %v1710_v37, %v1700_v34 }
 0x188   : > { %v1716_v39 = vpop.f32.mrf.mxu2 }
 0x189   : > { %v574_v2 = vmax.f32 %v1716_v39, %v1764_v61 }
 0x18a   : > { %v1778_v4 = vpop.f32.mrf.mxu0 }
 0x190   : > { %v1722_v42 = vpop.f32.mrf.mxu2 }
 0x191   : > { %v577_v7 = vmax.f32 %v1722_v42, %v1778_v4 }
 0x195   : > { %1348 = vmatmul.msk.bf16.gmra.mxu2 %vm226_vm1, %v306_v29  ;;  %1364 = vmatmul.msk.bf16.gmra.mxu3 %vm226_vm1, %v306_v29 }
 0x198   : > { %v1730_v45 = vpop.f32.mrf.mxu2  ;;  %v1732_v46 = vpop.f32.mrf.mxu3 }
 0x199   : > { %v580_v58 = vmax.f32 %v1730_v45, %v1732_v46 }
 0x1a0   : > { %v1736_v48 = vpop.f32.mrf.mxu2  ;;  %v1738_v49 = vpop.f32.mrf.mxu3 }
 0x1a1   : > { %v583_v0 = vmax.f32 %v1736_v48, %v1738_v49 }
 0x1a5   : > { %1349 = vmatmul.msk.bf16.gmra.mxu2 %vm226_vm1, %v308_v31  ;;  %1365 = vmatmul.msk.bf16.gmra.mxu3 %vm226_vm1, %v308_v31 }
 0x1a8   : > { %v1746_v52 = vpop.f32.mrf.mxu2  ;;  %v1748_v53 = vpop.f32.mrf.mxu3 }
 0x1a9   : > { %v586_v54 = vmax.f32 %v1746_v52, %v1748_v53 }
 0x1ab   : > { %587 = vmax.xlane.f32.xlu2 %v586_v54 }
 0x1b0   : > { %v1754_v56 = vpop.f32.mrf.mxu2  ;;  %v1756_v57 = vpop.f32.mrf.mxu3 }
 0x1b1   : > { %v589_v59 = vmax.f32 %v1754_v56, %v1756_v57 }
 0x1b3   : > { %581 = vmax.xlane.f32.xlu2 %v580_v58  ;;  %590 = vmax.xlane.f32.xlu1 %v589_v59 }
 0x1b5   : > { %1350 = vmatmul.msk.bf16.gmra.mxu2 %vm226_vm1, %v310_v18  ;;  %1366 = vmatmul.msk.bf16.gmra.mxu3 %vm226_vm1, %v310_v18 }
 0x1b8   : > { %v1766_v62 = vpop.f32.mrf.mxu2  ;;  %v1768_v63 = vpop.f32.mrf.mxu3 }
 0x1b9   : > { %v592_v1 = vmax.f32 %v1766_v62, %v1768_v63 }
 0x1bb   : > { %584 = vmax.xlane.f32.xlu1 %v583_v0  ;;  %593 = vmax.xlane.f32.xlu0 %v592_v1 }
 0x1bc   : > { %575 = vmax.xlane.f32.xlu2 %v574_v2 }
 0x1c0   : > { %v1780_v5 = vpop.f32.mrf.mxu2  ;;  %v1782_v6 = vpop.f32.mrf.mxu3 }
 0x1c1   : > { %v595_v27 = vmax.f32 %v1780_v5, %v1782_v6 }
 0x1c3   : > { %578 = vmax.xlane.f32.xlu1 %v577_v7 }
 0x1c4   : > { %569 = vmax.xlane.f32.xlu2 %v568_v8 }
 0x1c8   : > { %v1790_v10 = vpop.f32.mrf.mxu2  ;;  %v1792_v11 = vpop.f32.mrf.mxu3 }
 0x1c9   : > { %2505 = vst [vmem:[#allocation7_spill] sm:$0xff] %v1790_v10  ;;  %v598_v24 = vmax.f32 %v1790_v10, %v1792_v11 }
 0x1ca   : > { %2506 = vst [vmem:[#allocation8_spill] sm:$0xff] %v1792_v11 }
 0x1cb   : > { %572 = vmax.xlane.f32.xlu1 %v571_v12 }
 0x1cc   : > { %563 = vmax.xlane.f32.xlu2 %v562_v13 }
 0x1d0   : > { %v1798_v14 = vpop.f32.mrf.mxu2  ;;  %v1800_v15 = vpop.f32.mrf.mxu3 }
 0x1d1   : > { %2507 = vst [vmem:[#allocation9_spill] sm:$0xff] %v1798_v14  ;;  %v601_v31 = vmax.f32 %v1798_v14, %v1800_v15 }
 0x1d2   : > { %2508 = vst [vmem:[#allocation10_spill] sm:$0xff] %v1800_v15 }
 0x1d3   : > { %566 = vmax.xlane.f32.xlu1 %v565_v16 }
 0x1d4   : > { %557 = vmax.xlane.f32.xlu2 %v556_v17 }
 0x1d8   : > { %v1812_v21 = vpop.f32.mrf.mxu2  ;;  %v1814_v22 = vpop.f32.mrf.mxu3 }
 0x1d9   : > { %v604_v28 = vmax.f32 %v1812_v21, %v1814_v22 }
 0x1db   : > { %560 = vmax.xlane.f32.xlu1 %v559_v19 }
 0x1dc   : > { %551 = vmax.xlane.f32.xlu2 %v550_v20 }
 0x1e0   : > { %v1820_v25 = vpop.f32.mrf.mxu2  ;;  %v1822_v26 = vpop.f32.mrf.mxu3 }
 0x1e1   : > { %2509 = vst [vmem:[#allocation11_spill] sm:$0xff] %v1820_v25  ;;  %v607_v33 = vmax.f32 %v1820_v25, %v1822_v26 }
 0x1e2   : > { %2510 = vst [vmem:[#allocation12_spill] sm:$0xff] %v1822_v26 }
 0x1e3   : > { %554 = vmax.xlane.f32.xlu1 %v553_v23 }
 0x1e4   : > { %599 = vmax.xlane.f32.xlu2 %v598_v24 }
 0x1e8   : > { %v1828_v29 = vpop.f32.mrf.mxu2  ;;  %v1830_v30 = vpop.f32.mrf.mxu3 }
 0x1e9   : > { %v610_v32 = vmax.f32 %v1828_v29, %v1830_v30 }
 0x1eb   : > { %596 = vmax.xlane.f32.xlu1 %v595_v27 }
 0x1ec   : > { %605 = vmax.xlane.f32.xlu2 %v604_v28 }
 0x1f0   : > { %v1838_v54 = vpop.f32.mrf.mxu2  ;;  %v1840_v58 = vpop.f32.mrf.mxu3 }
 0x1f1   : > { %v613_v59 = vmax.f32 %v1838_v54, %v1840_v58 }
 0x1f3   : > { %602 = vmax.xlane.f32.xlu1 %v601_v31 }
 0x1f4   : > { %611 = vmax.xlane.f32.xlu2 %v610_v32 }
 0x1f8   : > { %v1852_v12 = vpop.f32.mrf.mxu2  ;;  %v1854_v13 = vpop.f32.mrf.mxu3 }
 0x1fb   : > { %608 = vmax.xlane.f32.xlu1 %v607_v33 }
 0x200   : > { %v1858_v24 = vpop.f32.mrf.mxu2  ;;  %v1860_v27 = vpop.f32.mrf.mxu3 }
 0x203   : > { %614 = vmax.xlane.f32.xlu1 %v613_v59 }
 0x21e   : > { %v1844_v0 = vpop.xlane.xlu2 %587 }
 0x226   : > { %v1846_v1 = vpop.xlane.xlu2 %581  ;;  %v1848_v2 = vpop.xlane.xlu1 %590 }
 0x22e   : > { %v1850_v7 = vpop.xlane.xlu1 %584 }
 0x22f   : > { %v576_v8 = vpop.xlane.xlu2 %575 }
 0x236   : > { %v579_v16 = vpop.xlane.xlu1 %578 }
 0x237   : > { %v570_v17 = vpop.xlane.xlu2 %569 }
 0x238   : > { %v658_v18 = vsub.f32 %v1776_v3, %v570_v17  ;;  %v659_v19 = vsub.f32 %v1740_v50, %v570_v17  ;;  %v1870_v17 = vpop.f32.mrf.mxu2 }
 0x23a   : > { %v734_v20 = vmul.f32 1.442695, %v658_v18  ;;  %v736_v23 = vmul.f32 1.442695, %v659_v19  ;;  %v1872_v18 = vpop.f32.mrf.mxu3 }
 0x23c   : > { %1401 = vpow2.f32 %v734_v20  ;;  %v663_v20 = vsub.f32 %v1764_v61, %v576_v8  ;;  %v665_v61 = vsub.f32 %v1778_v4, %v579_v16 }
 0x23d   : > { %1403 = vpow2.f32 %v736_v23 }
 0x23e   : > { %v573_v28 = vpop.xlane.xlu1 %572  ;;  %v744_v14 = vmul.f32 1.442695, %v663_v20  ;;  %v748_v34 = vmul.f32 1.442695, %v665_v61  ;;  %v667_v61 = vsub.f32 %v1732_v46, %v1846_v1 }
 0x23f   : > { %v660_v31 = vsub.f32 %v1788_v9, %v573_v28  ;;  %v661_v32 = vsub.f32 %v1752_v55, %v573_v28  ;;  %v662_v55 = vsub.f32 %v1716_v39, %v576_v8  ;;  %v616_v28 = vmax.f32 %v1852_v12, %v1854_v13  ;;  %v1896_v11 = vpop.xlane.xlu2 %563 }
 0x240   : > { %v664_v39 = vsub.f32 %v1722_v42, %v579_v16  ;;  %v622_v8 = vmax.f32 %v1870_v17, %v1872_v18 }
 0x241   : > { %v738_v33 = vmul.f32 1.442695, %v660_v31  ;;  %v740_v15 = vmul.f32 1.442695, %v661_v32  ;;  %v742_v32 = vmul.f32 1.442695, %v662_v55  ;;  %v619_v55 = vmax.f32 %v1858_v24, %v1860_v27 }
 0x242   : > { %v1864_v59 = vpop.eup %1401 }
 0x243   : > { %v1866_v3 = vpop.eup %1403  ;;  %1405 = vpow2.f32 %v738_v33  ;;  %v1888_v33 = vpop.f32.mrf.mxu2 }
 0x244   : > { %v856_v50 = vadd.f32 %v1866_v3, %v1864_v59  ;;  %1407 = vpow2.f32 %v740_v15 }
 0x245   : > { %1409 = vpow2.f32 %v742_v32 }
 0x246   : > { %857 = vadd.xlane.f32.xlu2 %v856_v50  ;;  %v1874_v19 = vpop.xlane.xlu1 %566  ;;  %v1890_v50 = vpop.f32.mrf.mxu3  ;;  %1411 = vpow2.f32 %v744_v14 }
 0x249   : > { %v1876_v9 = vpop.eup %1405 }
 0x24a   : > { %v1880_v23 = vpop.eup %1407 }
 0x24b   : > { %v859_v31 = vadd.f32 %v1880_v23, %v1876_v9  ;;  %v1902_v14 = vpop.eup %1409  ;;  %v1906_v16 = vpop.f32.mrf.mxu2 }
 0x24c   : > { %v1904_v4 = vpop.eup %1411 }
 0x24d   : > { %860 = vadd.xlane.f32.xlu1 %v859_v31 }
 0x24e   : > { %617 = vmax.xlane.f32.xlu2 %v616_v28  ;;  %v1886_v15 = vpop.xlane.xlu1 %560  ;;  %v746_v28 = vmul.f32 1.442695, %v664_v39  ;;  %v1908_v31 = vpop.f32.mrf.mxu3  ;;  %v666_v39 = vsub.f32 %v1730_v45, %v1846_v1 }
 0x250   : > { %1413 = vpow2.f32 %v746_v28 }
 0x251   : > { %1415 = vpow2.f32 %v748_v34 }
 0x253   : > { %v1926_v34 = vpop.f32.mrf.mxu2 }
 0x255   : > { %620 = vmax.xlane.f32.xlu1 %v619_v55  ;;  %v752_v55 = vmul.f32 1.442695, %v667_v61 }
 0x256   : > { %623 = vmax.xlane.f32.xlu2 %v622_v8  ;;  %v555_v10 = vpop.xlane.xlu1 %554  ;;  %v1920_v45 = vpop.eup %1413 }
 0x257   : > { %v648_v20 = vsub.f32 %v1718_v40, %v555_v10  ;;  %v649_v42 = vsub.f32 %v1704_v35, %v555_v10  ;;  %v862_v35 = vadd.f32 %v1904_v4, %v1902_v14  ;;  %v625_v40 = vmax.f32 %v1888_v33, %v1890_v50  ;;  %v1922_v28 = vpop.eup %1415  ;;  %v1928_v1 = vpop.f32.mrf.mxu3 }
 0x258   : > { %v750_v10 = vmul.f32 1.442695, %v666_v39  ;;  %v669_v39 = vsub.f32 %v1738_v49, %v1850_v7  ;;  %v865_v61 = vadd.f32 %v1922_v28, %v1920_v45  ;;  %v670_v49 = vsub.f32 %v1746_v52, %v1844_v0 }
 0x259   : > { %v714_v32 = vmul.f32 1.442695, %v648_v20  ;;  %v716_v8 = vmul.f32 1.442695, %v649_v42  ;;  %v1918_v20 = vpop.xlane.xlu2 %557  ;;  %v668_v42 = vsub.f32 %v1736_v48, %v1850_v7  ;;  %v671_v7 = vsub.f32 %v1748_v53, %v1844_v0 }
 0x25a   : > { %v756_v48 = vmul.f32 1.442695, %v669_v39  ;;  %v631_v39 = vmax.f32 %v1926_v34, %v1928_v1  ;;  %v672_v53 = vsub.f32 %v1754_v56, %v1848_v2 }
 0x25b   : > { %1417 = vpow2.f32 %v714_v32 }
 0x25c   : > { %1419 = vpow2.f32 %v716_v8  ;;  %v628_v8 = vmax.f32 %v1906_v16, %v1908_v31 }
 0x25d   : > { %626 = vmax.xlane.f32.xlu1 %v625_v40  ;;  %1421 = vpow2.f32 %v750_v10  ;;  %v754_v40 = vmul.f32 1.442695, %v668_v42 }
 0x25e   : > { %863 = vadd.xlane.f32.xlu2 %v862_v35  ;;  %1423 = vpow2.f32 %v752_v55 }
 0x25f   : > { %1425 = vpow2.f32 %v754_v40 }
 0x260   : > { %1427 = vpow2.f32 %v756_v48 }
 0x261   : > { %v1924_v46 = vpop.eup %1417  ;;  %v1946_v26 = vpop.xlane.xlu2 %551 }
 0x262   : > { %2511 = vst [vmem:[#allocation13_spill] sm:$0xff] %v1924_v46  ;;  %v1932_v32 = vpop.eup %1419 }
 0x263   : > { %2512 = vst [vmem:[#allocation14_spill] sm:$0xff] %v1932_v32  ;;  %v841_v35 = vadd.f32 %v1932_v32, %v1924_v46  ;;  %v1942_v10 = vpop.eup %1421  ;;  %v760_v32 = vmul.f32 1.442695, %v671_v7  ;;  %v594_v46 = vpop.xlane.xlu0 %593 }
 0x264   : > { %2513 = vst [vmem:[#allocation15_spill] sm:$0xff] %v1942_v10  ;;  %v1944_v55 = vpop.eup %1423  ;;  %v674_v40 = vsub.f32 %v1766_v62, %v594_v46  ;;  %v675_v48 = vsub.f32 %v1768_v63, %v594_v46 }
 0x265   : > { %866 = vadd.xlane.f32.xlu1 %v865_v61  ;;  %842 = vadd.xlane.f32.xlu0 %v841_v35  ;;  %2514 = vst [vmem:[#allocation16_spill] sm:$0xff] %v1946_v26  ;;  %v868_v42 = vadd.f32 %v1944_v55, %v1942_v10  ;;  %v1956_v61 = vpop.f32.mrf.mxu3  ;;  %v758_v35 = vmul.f32 1.442695, %v670_v49  ;;  %v1960_v52 = vpop.eup %1425  ;;  %v673_v49 = vsub.f32 %v1756_v57, %v1848_v2 }
 0x266   : > { %629 = vmax.xlane.f32.xlu2 %v628_v8  ;;  %v1954_v8 = vpop.f32.mrf.mxu2  ;;  %2515 = vst [vmem:[#allocation17_spill] sm:$0xff] %v1960_v52  ;;  %v1964_v0 = vpop.eup %1427 }
 0x267   : > { %1429 = vpow2.f32 %v758_v35  ;;  %v634_v7 = vmax.f32 %v1954_v8, %v1956_v61  ;;  %v871_v56 = vadd.f32 %v1964_v0, %v1960_v52  ;;  %v768_v35 = vmul.f32 1.442695, %v675_v48 }
 0x268   : > { %1431 = vpow2.f32 %v760_v32  ;;  %v764_v46 = vmul.f32 1.442695, %v673_v49 }
 0x269   : > { %v1968_v10 = vpop.xlane.xlu2 %599 }
 0x26a   : > { %2516 = vst [vmem:[#allocation18_spill] sm:$0xff] %v1968_v10 }
 0x26d   : > { %632 = vmax.xlane.f32.xlu1 %v631_v39  ;;  %v766_v39 = vmul.f32 1.442695, %v674_v40  ;;  %v1978_v62 = vpop.f32.mrf.mxu3  ;;  %v1980_v63 = vpop.eup %1429 }
 0x26e   : > { %869 = vadd.xlane.f32.xlu2 %v868_v42  ;;  %v762_v42 = vmul.f32 1.442695, %v672_v53  ;;  %v1976_v37 = vpop.f32.mrf.mxu2  ;;  %2517 = vst [vmem:[#allocation19_spill] sm:$0xff] %v1980_v63  ;;  %v1982_v32 = vpop.eup %1431 }
 0x26f   : > { %v874_v57 = vadd.f32 %v1982_v32, %v1980_v63  ;;  %v637_v53 = vmax.f32 %v1976_v37, %v1978_v62 }
 0x270   : > { %1433 = vpow2.f32 %v762_v42 }
 0x271   : > { %1435 = vpow2.f32 %v766_v39  ;;  %v1986_v2 = vpop.xlane.xlu2 %605 }
 0x272   : > { %1437 = vpow2.f32 %v768_v35  ;;  %v655_v35 = vsub.f32 %v1720_v41, %v1896_v11 }
 0x273   : > { %1439 = vpow2.f32 %v764_v46  ;;  %v656_v46 = vsub.f32 %v1762_v60, %v1874_v19 }
 0x274   : > { %v728_v10 = vmul.f32 1.442695, %v655_v35 }
 0x275   : > { %872 = vadd.xlane.f32.xlu1 %v871_v56  ;;  %v1994_v49 = vpop.f32.mrf.mxu3  ;;  %v654_v56 = vsub.f32 %v1744_v51, %v1896_v11  ;;  %v597_v51 = vpop.xlane.xlu1 %596  ;;  %v730_v26 = vmul.f32 1.442695, %v656_v46 }
 0x276   : > { %635 = vmax.xlane.f32.xlu2 %v634_v7  ;;  %v1990_v40 = vpop.eup %1433  ;;  %v1992_v48 = vpop.f32.mrf.mxu2  ;;  %v676_v60 = vsub.f32 %v1780_v5, %v597_v51  ;;  %v677_v35 = vsub.f32 %v1782_v6, %v597_v51 }
 0x277   : > { %v1996_v7 = vpop.eup %1435  ;;  %v726_v52 = vmul.f32 1.442695, %v654_v56  ;;  %v640_v5 = vmax.f32 %v1992_v48, %v1994_v49 }
 0x278   : > { %v1998_v42 = vpop.eup %1437  ;;  %v770_v46 = vmul.f32 1.442695, %v676_v60 }
 0x279   : > { %v2002_v39 = vpop.eup %1439  ;;  %v612_v25 = vpop.xlane.xlu2 %611  ;;  %1441 = vpow2.f32 %v726_v52 }
 0x27a   : > { %v877_v63 = vadd.f32 %v2002_v39, %v1990_v40  ;;  %1443 = vpow2.f32 %v728_v10  ;;  %v687_v56 = vsub.f32 %v1830_v30, %v612_v25 }
 0x27b   : > { %1445 = vpow2.f32 %v730_v26  ;;  %v772_v26 = vmul.f32 1.442695, %v677_v35 }
 0x27c   : > { %v792_v10 = vmul.f32 1.442695, %v687_v56 }
 0x27d   : > { %638 = vmax.xlane.f32.xlu1 %v637_v53  ;;  %v880_v53 = vadd.f32 %v1998_v42, %v1996_v7 }
 0x27e   : > { %875 = vadd.xlane.f32.xlu2 %v874_v57  ;;  %v657_v57 = vsub.f32 %v1728_v44, %v1874_v19  ;;  %v2015_v11 = vpop.f32.mrf.mxu2  ;;  %v2017_v44 = vpop.f32.mrf.mxu3  ;;  %v686_v19 = vsub.f32 %v1828_v29, %v612_v25 }
 0x280   : > { %v732_v41 = vmul.f32 1.442695, %v657_v57  ;;  %v790_v52 = vmul.f32 1.442695, %v686_v19  ;;  %v2026_v57 = vpop.eup %1441 }
 0x281   : > { %2518 = vst [vmem:[#allocation20_spill] sm:$0xff] %v2026_v57  ;;  %v2028_v29 = vpop.eup %1443 }
 0x282   : > { %1447 = vpow2.f32 %v732_v41  ;;  %v2030_v25 = vpop.eup %1445  ;;  %v850_v30 = vadd.f32 %v2028_v29, %v2026_v57 }
 0x283   : > { %2519 = vst [vmem:[#allocation21_spill] sm:$0xff] %v2030_v25  ;;  %1449 = vpow2.f32 %v770_v46 }
 0x284   : > { %1451 = vpow2.f32 %v790_v52 }
 0x285   : > { %878 = vadd.xlane.f32.xlu1 %v877_v63  ;;  %v643_v63 = vmax.f32 %v2015_v11, %v2017_v44  ;;  %1453 = vpow2.f32 %v792_v10 }
 0x286   : > { %881 = vadd.xlane.f32.xlu2 %v880_v53  ;;  %1455 = vpow2.f32 %v772_v26 }
 0x288   : > { %v2032_v6 = vpop.eup %1447 }
 0x289   : > { %v853_v53 = vadd.f32 %v2032_v6, %v2030_v25  ;;  %v2038_v51 = vpop.eup %1449 }
 0x28a   : > { %v2040_v41 = vpop.eup %1451 }
 0x28b   : > { %2520 = vst [vmem:[#allocation22_spill] sm:$0xff] %v2040_v41  ;;  %v2042_v60 = vpop.eup %1453 }
 0x28c   : > { %2521 = vst [vmem:[#allocation23_spill] sm:$0xff] %v2042_v60  ;;  %v2044_v19 = vpop.eup %1455  ;;  %v898_v56 = vadd.f32 %v2042_v60, %v2040_v41 }
 0x28d   : > { %641 = vmax.xlane.f32.xlu1 %v640_v5  ;;  %v883_v35 = vadd.f32 %v2044_v19, %v2038_v51 }
 0x28e   : > { %644 = vmax.xlane.f32.xlu2 %v643_v63  ;;  %v2050_v63 = vpop.xlane.xlu1 %602 }
 0x28f   : > { %2522 = vst [vmem:[#allocation24_spill] sm:$0xff] %v2050_v63 }
 0x295   : > { %854 = vadd.xlane.f32.xlu1 %v853_v53 }
 0x296   : > { %851 = vadd.xlane.f32.xlu2 %v850_v30  ;;  %v2052_v46 = vpop.xlane.xlu1 %608 }
 0x29d   : > { %884 = vadd.xlane.f32.xlu1 %v883_v35 }
 0x29e   : > { %899 = vadd.xlane.f32.xlu2 %v898_v56  ;;  %v2054_v52 = vpop.xlane.xlu1 %614 }
 0x2b9   : > { %v858_v5 = vpop.xlane.xlu2 %857 }
 0x2ba   : > { %1457 = vrcp.f32 %v858_v5 }
 0x2c0   : > { %v861_v53 = vpop.xlane.xlu1 %860  ;;  %v1458_v25 = vpop.eup %1457 }
 0x2c1   : > { %v618_v10 = vpop.xlane.xlu2 %617  ;;  %1459 = vrcp.f32 %v861_v53  ;;  %v2059_v57 = vmul.f32 %v1458_v25, %v1864_v59  ;;  %v2062_v63 = vmul.f32 %v1458_v25, %v1866_v3 }
 0x2c2   : > { %v690_v26 = vsub.f32 %v1852_v12, %v618_v10  ;;  %v691_v30 = vsub.f32 %v1854_v13, %v618_v10 }
 0x2c3   : > { %2523 = vst [vmem:[#allocation25_spill] sm:$0xff] %v2062_v63 }
 0x2c4   : > { %v798_v60 = vmul.f32 1.442695, %v690_v26  ;;  %v800_v41 = vmul.f32 1.442695, %v691_v30 }
 0x2c6   : > { %1461 = vpow2.f32 %v798_v60 }
 0x2c7   : > { %1463 = vpow2.f32 %v800_v41  ;;  %v1460_v56 = vpop.eup %1459 }
 0x2c8   : > { %v621_v13 = vpop.xlane.xlu1 %620  ;;  %v2067_v10 = vmul.f32 %v1460_v56, %v1876_v9  ;;  %v2070_v26 = vmul.f32 %v1460_v56, %v1880_v23 }
 0x2c9   : > { %v624_v35 = vpop.xlane.xlu2 %623  ;;  %v692_v41 = vsub.f32 %v1858_v24, %v621_v13  ;;  %v693_v60 = vsub.f32 %v1860_v27, %v621_v13 }
 0x2ca   : > { %v694_v5 = vsub.f32 %v1870_v17, %v624_v35  ;;  %v695_v12 = vsub.f32 %v1872_v18, %v624_v35 }
 0x2cb   : > { %v802_v9 = vmul.f32 1.442695, %v692_v41  ;;  %v804_v53 = vmul.f32 1.442695, %v693_v60 }
 0x2cc   : > { %v2074_v59 = vpop.eup %1461  ;;  %v806_v30 = vmul.f32 1.442695, %v694_v5  ;;  %v808_v3 = vmul.f32 1.442695, %v695_v12 }
 0x2cd   : > { %v2080_v25 = vpop.eup %1463 }
 0x2ce   : > { %2524 = vst [vmem:[#allocation26_spill] sm:$0xff] %v2080_v25  ;;  %1465 = vpow2.f32 %v806_v30  ;;  %v904_v24 = vadd.f32 %v2080_v25, %v2074_v59 }
 0x2cf   : > { %1467 = vpow2.f32 %v808_v3 }
 0x2d0   : > { %1469 = vpow2.f32 %v802_v9  ;;  %905 = vadd.xlane.f32.xlu2 %v904_v24  ;;  %v627_v23 = vpop.xlane.xlu1 %626 }
 0x2d1   : > { %1471 = vpow2.f32 %v804_v53  ;;  %v864_v27 = vpop.xlane.xlu2 %863  ;;  %v696_v56 = vsub.f32 %v1888_v33, %v627_v23  ;;  %v697_v35 = vsub.f32 %v1890_v50, %v627_v23 }
 0x2d3   : > { %v810_v13 = vmul.f32 1.442695, %v696_v56  ;;  %v812_v41 = vmul.f32 1.442695, %v697_v35 }
 0x2d4   : > { %v2086_v5 = vpop.eup %1465 }
 0x2d5   : > { %v2088_v12 = vpop.eup %1467  ;;  %1473 = vpow2.f32 %v810_v13 }
 0x2d6   : > { %2525 = vst [vmem:[#allocation27_spill] sm:$0xff] %v2088_v12  ;;  %v2090_v60 = vpop.eup %1469  ;;  %v910_v30 = vadd.f32 %v2088_v12, %v2086_v5  ;;  %1475 = vpow2.f32 %v812_v41 }
 0x2d7   : > { %v2094_v3 = vpop.eup %1471  ;;  %1477 = vrcp.f32 %v864_v27 }
 0x2d8   : > { %2526 = vst [vmem:[#allocation28_spill] sm:$0xff] %v2094_v3  ;;  %911 = vadd.xlane.f32.xlu2 %v910_v30  ;;  %v907_v33 = vadd.f32 %v2094_v3, %v2090_v60  ;;  %v867_v24 = vpop.xlane.xlu1 %866 }
 0x2d9   : > { %v630_v50 = vpop.xlane.xlu2 %629  ;;  %1479 = vrcp.f32 %v867_v24 }
 0x2da   : > { %908 = vadd.xlane.f32.xlu1 %v907_v33  ;;  %v698_v9 = vsub.f32 %v1906_v16, %v630_v50  ;;  %v699_v53 = vsub.f32 %v1908_v31, %v630_v50 }
 0x2db   : > { %v2100_v35 = vpop.eup %1473 }
 0x2dc   : > { %v814_v23 = vmul.f32 1.442695, %v698_v9  ;;  %v816_v56 = vmul.f32 1.442695, %v699_v53  ;;  %v2102_v18 = vpop.eup %1475 }
 0x2dd   : > { %v1478_v13 = vpop.eup %1477  ;;  %v913_v27 = vadd.f32 %v2102_v18, %v2100_v35 }
 0x2de   : > { %1481 = vpow2.f32 %v814_v23  ;;  %v2107_v31 = vmul.f32 %v1478_v13, %v1902_v14  ;;  %v2110_v33 = vmul.f32 %v1478_v13, %v1904_v4 }
 0x2df   : > { %1483 = vpow2.f32 %v816_v56  ;;  %v1480_v30 = vpop.eup %1479 }
 0x2e0   : > { %v633_v16 = vpop.xlane.xlu1 %632  ;;  %v2115_v53 = vmul.f32 %v1480_v30, %v1920_v45  ;;  %v2118_v24 = vmul.f32 %v1480_v30, %v1922_v28 }
 0x2e1   : > { %v870_v41 = vpop.xlane.xlu2 %869  ;;  %v700_v50 = vsub.f32 %v1926_v34, %v633_v16  ;;  %v701_v9 = vsub.f32 %v1928_v1, %v633_v16 }
 0x2e2   : > { %914 = vadd.xlane.f32.xlu1 %v913_v27 }
 0x2e3   : > { %v818_v27 = vmul.f32 1.442695, %v700_v50  ;;  %v820_v14 = vmul.f32 1.442695, %v701_v9 }
 0x2e4   : > { %v2120_v23 = vpop.eup %1481 }
 0x2e5   : > { %v2122_v56 = vpop.eup %1483  ;;  %1485 = vpow2.f32 %v818_v27 }
 0x2e6   : > { %v916_v1 = vadd.f32 %v2122_v56, %v2120_v23  ;;  %1487 = vpow2.f32 %v820_v14 }
 0x2e7   : > { %1489 = vrcp.f32 %v870_v41 }
 0x2e8   : > { %917 = vadd.xlane.f32.xlu2 %v916_v1  ;;  %v873_v30 = vpop.xlane.xlu1 %872 }
 0x2e9   : > { %v636_v45 = vpop.xlane.xlu2 %635  ;;  %1491 = vrcp.f32 %v873_v30 }
 0x2ea   : > { %v702_v28 = vsub.f32 %v1954_v8, %v636_v45  ;;  %v703_v13 = vsub.f32 %v1956_v61, %v636_v45 }
 0x2eb   : > { %v2132_v9 = vpop.eup %1485 }
 0x2ec   : > { %v822_v16 = vmul.f32 1.442695, %v702_v28  ;;  %v824_v50 = vmul.f32 1.442695, %v703_v13  ;;  %v2134_v17 = vpop.eup %1487 }
 0x2ed   : > { %v2136_v34 = vpop.eup %1489  ;;  %v919_v41 = vadd.f32 %v2134_v17, %v2132_v9 }
 0x2ee   : > { %1493 = vpow2.f32 %v822_v16  ;;  %v2144_v14 = vmul.f32 %v2136_v34, %v1944_v55 }
 0x2ef   : > { %1495 = vpow2.f32 %v824_v50  ;;  %v2140_v27 = vpop.eup %1491  ;;  %920 = vadd.xlane.f32.xlu1 %v919_v41 }
 0x2f0   : > { %v639_v61 = vpop.xlane.xlu1 %638  ;;  %v2148_v1 = vmul.f32 %v2140_v27, %v1964_v0 }
 0x2f1   : > { %v876_v8 = vpop.xlane.xlu2 %875  ;;  %v704_v45 = vsub.f32 %v1976_v37, %v639_v61  ;;  %v705_v28 = vsub.f32 %v1978_v62, %v639_v61 }
 0x2f3   : > { %v826_v50 = vmul.f32 1.442695, %v704_v45  ;;  %v828_v41 = vmul.f32 1.442695, %v705_v28 }
 0x2f4   : > { %v2152_v13 = vpop.eup %1493 }
 0x2f5   : > { %v2156_v16 = vpop.eup %1495  ;;  %1497 = vpow2.f32 %v826_v50 }
 0x2f6   : > { %v922_v55 = vadd.f32 %v2156_v16, %v2152_v13  ;;  %1499 = vpow2.f32 %v828_v41 }
 0x2f7   : > { %1501 = vrcp.f32 %v876_v8 }
 0x2f8   : > { %923 = vadd.xlane.f32.xlu2 %v922_v55  ;;  %v879_v37 = vpop.xlane.xlu1 %878 }
 0x2f9   : > { %v882_v0 = vpop.xlane.xlu2 %881  ;;  %1503 = vrcp.f32 %v879_v37 }
 0x2fb   : > { %v2160_v62 = vpop.eup %1497 }
 0x2fc   : > { %v2162_v61 = vpop.eup %1499 }
 0x2fd   : > { %v2164_v4 = vpop.eup %1501  ;;  %v925_v45 = vadd.f32 %v2162_v61, %v2160_v62 }
 0x2fe   : > { %v2174_v55 = vmul.f32 %v2164_v4, %v1982_v32  ;;  %v689_v32 = vsub.f32 %v1840_v58, %v2054_v52 }
 0x2ff   : > { %v2168_v28 = vpop.eup %1503  ;;  %926 = vadd.xlane.f32.xlu1 %v925_v45  ;;  %v688_v45 = vsub.f32 %v1838_v54, %v2054_v52 }
 0x300   : > { %v642_v41 = vpop.xlane.xlu1 %641  ;;  %v2178_v37 = vmul.f32 %v2168_v28, %v2002_v39  ;;  %v650_v39 = vsub.f32 %v1724_v43, %v1918_v20  ;;  %v796_v54 = vmul.f32 1.442695, %v689_v32  ;;  %v652_v43 = vsub.f32 %v1734_v47, %v1886_v15 }
 0x301   : > { %v645_v30 = vpop.xlane.xlu2 %644  ;;  %v706_v25 = vsub.f32 %v1992_v48, %v642_v41  ;;  %v707_v3 = vsub.f32 %v1994_v49, %v642_v41  ;;  %v651_v48 = vsub.f32 %v1708_v36, %v1918_v20  ;;  %v794_v49 = vmul.f32 1.442695, %v688_v45 }
 0x302   : > { %v708_v50 = vsub.f32 %v2015_v11, %v645_v30  ;;  %v709_v8 = vsub.f32 %v2017_v44, %v645_v30  ;;  %v653_v36 = vsub.f32 %v1712_v38, %v1886_v15  ;;  %v683_v47 = vsub.f32 %v1814_v22, %v1986_v2 }
 0x303   : > { %v830_v30 = vmul.f32 1.442695, %v706_v25  ;;  %v832_v63 = vmul.f32 1.442695, %v707_v3  ;;  %v720_v44 = vmul.f32 1.442695, %v651_v48 }
 0x304   : > { %v834_v12 = vmul.f32 1.442695, %v708_v50  ;;  %v836_v11 = vmul.f32 1.442695, %v709_v8  ;;  %v718_v8 = vmul.f32 1.442695, %v650_v39 }
 0x305   : > { %v722_v45 = vmul.f32 1.442695, %v652_v43  ;;  %v784_v39 = vmul.f32 1.442695, %v683_v47 }
 0x306   : > { %1505 = vpow2.f32 %v834_v12 }
 0x307   : > { %1507 = vpow2.f32 %v836_v11  ;;  %v724_v11 = vmul.f32 1.442695, %v653_v36 }
 0x308   : > { %1509 = vpow2.f32 %v830_v30  ;;  %v855_v41 = vpop.xlane.xlu1 %854 }
 0x309   : > { %1511 = vpow2.f32 %v832_v63  ;;  %v852_v50 = vpop.xlane.xlu2 %851  ;;  %v682_v63 = vsub.f32 %v1812_v21, %v1986_v2 }
 0x30a   : > { %1513 = vrcp.f32 %v852_v50  ;;  %v2528_v50 = vld [vmem:[#allocation16_spill] sm:$0xff] }
 0x30b   : > { %1515 = vrcp.f32 %v855_v41 }
 0x30c   : > { %v2192_v58 = vpop.eup %1505  ;;  %1517 = vpow2.f32 %v794_v49 }
 0x30d   : > { %v2196_v52 = vpop.eup %1507  ;;  %1519 = vpow2.f32 %v796_v54 }
 0x30e   : > { %v2200_v20 = vpop.eup %1509  ;;  %1521 = vpow2.f32 %v718_v8  ;;  %v931_v25 = vadd.f32 %v2196_v52, %v2192_v58  ;;  %v2529_v8 = vld [vmem:[#allocation6_spill] sm:$0xff] }
 0x30f   : > { %v2206_v12 = vpop.eup %1511  ;;  %1523 = vpow2.f32 %v720_v44  ;;  %v782_v44 = vmul.f32 1.442695, %v682_v63  ;;  %v646_v41 = vsub.f32 %v2529_v8, %v2528_v50 }
 0x310   : > { %v2210_v3 = vpop.eup %1513  ;;  %932 = vadd.xlane.f32.xlu1 %v931_v25  ;;  %v928_v38 = vadd.f32 %v2206_v12, %v2200_v20  ;;  %1525 = vrcp.f32 %v882_v0  ;;  %v885_v22 = vpop.xlane.xlu1 %884  ;;  %v2527_v0 = vld [vmem:[#allocation11_spill] sm:$0xff]  ;;  %v2531_v25 = vld [vmem:[#allocation5_spill] sm:$0xff] }
 0x311   : > { %v2214_v15 = vpop.eup %1515  ;;  %v2218_v21 = vmul.f32 %v2210_v3, %v2028_v29  ;;  %1527 = vrcp.f32 %v885_v22  ;;  %v684_v29 = vsub.f32 %v2527_v0, %v2052_v46  ;;  %v647_v47 = vsub.f32 %v2531_v25, %v2528_v50  ;;  %v2533_v25 = vld [vmem:[#allocation7_spill] sm:$0xff] }
 0x312   : > { %v2220_v32 = vpop.eup %1517  ;;  %929 = vadd.xlane.f32.xlu2 %v928_v38  ;;  %v2224_v2 = vmul.f32 %v2214_v15, %v2032_v6  ;;  %1529 = vpow2.f32 %v722_v45  ;;  %v2530_v6 = vld [vmem:[#allocation12_spill] sm:$0xff]  ;;  %v710_v0 = vmul.f32 1.442695, %v646_v41 }
 0x313   : > { %v2226_v30 = vpop.eup %1519  ;;  %1531 = vpow2.f32 %v724_v11  ;;  %v685_v43 = vsub.f32 %v2530_v6, %v2052_v46  ;;  %v786_v45 = vmul.f32 1.442695, %v684_v29  ;;  %v712_v29 = vmul.f32 1.442695, %v647_v47  ;;  %v2535_v47 = vld [vmem:[#allocation24_spill] sm:$0xff] }
 0x314   : > { %v2228_v48 = vpop.eup %1521  ;;  %1533 = vpow2.f32 %v782_v44  ;;  %v901_v36 = vadd.f32 %v2226_v30, %v2220_v32 }
 0x315   : > { %v2234_v54 = vpop.eup %1523  ;;  %1535 = vpow2.f32 %v784_v39  ;;  %v788_v11 = vmul.f32 1.442695, %v685_v43 }
 0x316   : > { %v1526_v63 = vpop.eup %1525  ;;  %v844_v38 = vadd.f32 %v2234_v54, %v2228_v48  ;;  %1537 = vpow2.f32 %v786_v45 }
 0x317   : > { %v1528_v22 = vpop.eup %1527  ;;  %v994_v46 = vmul.f32 %v1526_v63, %v1996_v7  ;;  %v2250_v44 = vmul.f32 %v1526_v63, %v1998_v42  ;;  %v992_v7 = vmul.f32 %v2168_v28, %v1990_v40  ;;  %1539 = vpow2.f32 %v788_v11  ;;  %v2538_v28 = vld [vmem:[#allocation10_spill] sm:$0xff] }
 0x318   : > { %902 = vadd.xlane.f32.xlu1 %v901_v36  ;;  %v2246_v8 = vpop.eup %1529  ;;  %v996_v6 = vmul.f32 %v1528_v22, %v2038_v51  ;;  %v2254_v50 = vmul.f32 %v1528_v22, %v2044_v19  ;;  %v2532_v36 = vld [vmem:[#allocation18_spill] sm:$0xff]  ;;  %v2534_v19 = vld [vmem:[#allocation8_spill] sm:$0xff]  ;;  %1541 = vpow2.f32 %v710_v0 }
 0x319   : > { %v2256_v39 = vpop.eup %1531  ;;  %v678_v41 = vsub.f32 %v2533_v25, %v2532_v36  ;;  %v679_v63 = vsub.f32 %v2534_v19, %v2532_v36  ;;  %1543 = vpow2.f32 %v712_v29  ;;  %v2539_v36 = vld [vmem:[#allocation17_spill] sm:$0xff] }
 0x31a   : > { %845 = vadd.xlane.f32.xlu2 %v844_v38  ;;  %v2260_v43 = vpop.eup %1533  ;;  %v1044_v49 = vpack.c.bf16 %v996_v6, %v994_v46  ;;  %v2536_v38 = vld [vmem:[#allocation9_spill] sm:$0xff]  ;;  %v847_v45 = vadd.f32 %v2256_v39, %v2246_v8  ;;  %v2537_v46 = vld [vmem:[#allocation19_spill] sm:$0xff]  ;;  %v681_v6 = vsub.f32 %v2538_v28, %v2535_v47  ;;  %v988_v19 = vmul.f32 %v2140_v27, %v2539_v36 }
 0x31b   : > { %v2266_v51 = vpop.eup %1535  ;;  %v680_v22 = vsub.f32 %v2536_v38, %v2535_v47  ;;  %v990_v40 = vmul.f32 %v2164_v4, %v2537_v46  ;;  %v774_v25 = vmul.f32 1.442695, %v678_v41  ;;  %v2540_v4 = vld [vmem:[#allocation15_spill] sm:$0xff]  ;;  %v2544_v36 = vpack.c.bf16 %v2067_v10, %v2059_v57 }
 0x31c   : > { %1072 = vmatpush.bf16.msra.mxu0 %v1044_v49  ;;  %v892_v11 = vadd.f32 %v2266_v51, %v2260_v43  ;;  %v776_v49 = vmul.f32 1.442695, %v679_v63  ;;  %v2282_v38 = vpop.eup %1537  ;;  %v986_v29 = vmul.f32 %v2136_v34, %v2540_v4  ;;  %v780_v41 = vmul.f32 1.442695, %v681_v6 }
 0x31d   : > { %v1042_v0 = vpack.c.bf16 %v992_v7, %v990_v40  ;;  %v778_v42 = vmul.f32 1.442695, %v680_v22  ;;  %v2286_v46 = vpop.eup %1539  ;;  %1545 = vpow2.f32 %v774_v25  ;;  %v2541_v22 = vpack.c.bf16 %v2115_v53, %v2107_v31  ;;  %v2543_v25 = vld [vmem:[#allocation21_spill] sm:$0xff] }
 0x31e   : > { %v2288_v47 = vpop.eup %1541  ;;  %1547 = vpow2.f32 %v776_v49  ;;  %v895_v27 = vadd.f32 %v2286_v46, %v2282_v38 }
 0x31f   : > { %v2290_v7 = vpop.eup %1543  ;;  %1549 = vpow2.f32 %v778_v42  ;;  %v2542_v42 = vld [vmem:[#allocation20_spill] sm:$0xff] }
 0x320   : > { %848 = vadd.xlane.f32.xlu1 %v847_v45  ;;  %1073 = vmatpush.bf16.msra.mxu0 %v1042_v0  ;;  %v1040_v45 = vpack.c.bf16 %v988_v19, %v986_v29  ;;  %1551 = vpow2.f32 %v780_v41  ;;  %v838_v34 = vadd.f32 %v2290_v7, %v2288_v47  ;;  %v974_v6 = vmul.f32 %v2210_v3, %v2542_v42  ;;  %v900_v3 = vpop.xlane.xlu2 %899 }
 0x322   : > { %893 = vadd.xlane.f32.xlu2 %v892_v11  ;;  %v976_v11 = vmul.f32 %v2214_v15, %v2543_v25 }
 0x323   : > { %v2296_v63 = vpop.eup %1545 }
 0x324   : > { %1074 = vmatpush.bf16.msra.mxu0 %v1040_v45  ;;  %v2301_v40 = vpop.eup %1547  ;;  %v1034_v19 = vpack.c.bf16 %v976_v11, %v974_v6 }
 0x325   : > { %v2303_v28 = vpop.eup %1549  ;;  %v886_v31 = vadd.f32 %v2301_v40, %v2296_v63 }
 0x326   : > { %v2309_v0 = vpop.eup %1551 }
 0x327   : > { %v889_v53 = vadd.f32 %v2309_v0, %v2303_v28 }
 0x328   : > { %896 = vadd.xlane.f32.xlu1 %v895_v27  ;;  %1075 = vmatpush.bf16.msra.mxu0 %v2541_v22 }
 0x32a   : > { %839 = vadd.xlane.f32.xlu2 %v838_v34 }
 0x32c   : > { %1076 = vmatpush.bf16.msra.mxu0 %v2544_v36 }
 0x330   : > { %887 = vadd.xlane.f32.xlu1 %v886_v31  ;;  %1077 = vmatpush.bf16.msra.mxu0 %v1034_v19 }
 0x332   : > { %890 = vadd.xlane.f32.xlu2 %v889_v53 }
 0x343   : > { %v906_v4 = vpop.xlane.xlu2 %905 }
 0x34b   : > { %v912_v29 = vpop.xlane.xlu2 %911 }
 0x34d   : > { %v909_v49 = vpop.xlane.xlu1 %908 }
 0x355   : > { %v915_v15 = vpop.xlane.xlu1 %914 }
 0x35b   : > { %v918_v45 = vpop.xlane.xlu2 %917 }
 0x362   : > { %v921_v41 = vpop.xlane.xlu1 %920 }
 0x36b   : > { %v924_v57 = vpop.xlane.xlu2 %923 }
 0x372   : > { %v927_v27 = vpop.xlane.xlu1 %926 }
 0x383   : > { %v933_v10 = vpop.xlane.xlu1 %932 }
 0x384   : > { %1553 = vrcp.f32 %v933_v10  ;;  %v2340_v10 = vld.sshfl [vmem:[#allocation1] sm:$0xff pattern:$0x73625140] }
 0x385   : > { %1555 = vrcp.f32 %v927_v27  ;;  %v930_v34 = vpop.xlane.xlu2 %929 }
 0x386   : > { %1557 = vrcp.f32 %v930_v34 }
 0x387   : > { %1559 = vrcp.f32 %v924_v57 }
 0x388   : > { %1561 = vrcp.f32 %v921_v41 }
 0x389   : > { %1563 = vrcp.f32 %v918_v45 }
 0x38a   : > { %v2318_v22 = vpop.eup %1553  ;;  %1565 = vrcp.f32 %v915_v15 }
 0x38b   : > { %v2320_v42 = vpop.eup %1555  ;;  %v1028_v6 = vmul.f32 %v2318_v22, %v2192_v58  ;;  %v903_v25 = vpop.xlane.xlu1 %902  ;;  %1567 = vrcp.f32 %v912_v29  ;;  %v2344_v29 = vld.sshfl [vmem:[#allocation1 + $0x8] sm:$0xff pattern:$0x73625140] }
 0x38c   : > { %v2324_v11 = vpop.eup %1557  ;;  %v1024_v41 = vmul.f32 %v2320_v42, %v2160_v62  ;;  %1569 = vrcp.f32 %v909_v49 }
 0x38d   : > { %v1026_v36 = vmul.f32 %v2324_v11, %v2200_v20  ;;  %v846_v31 = vpop.xlane.xlu2 %845  ;;  %v2328_v53 = vpop.eup %1559 }
 0x38e   : > { %v2332_v27 = vpop.eup %1561  ;;  %v1022_v58 = vmul.f32 %v2328_v53, %v2152_v13  ;;  %1571 = vrcp.f32 %v846_v31  ;;  %v1136_v13 = vld [vmem:[%s2477_s3] sm:$0xff] }
 0x38f   : > { %v1060_v19 = vpack.c.bf16 %v1028_v6, %v1026_v36  ;;  %v2336_v45 = vpop.eup %1563  ;;  %1573 = vrcp.f32 %v906_v4  ;;  %v1020_v15 = vmul.f32 %v2332_v27, %v2132_v9  ;;  %1138 = vst [vmem:[#allocation1] ss:$2 sm:$0xff] %v1136_v13  ;;  %v843_v9 = vpop.xlane.xlu0 %842 }
 0x390   : > { %v1058_v20 = vpack.c.bf16 %v1024_v41, %v1022_v58  ;;  %v2342_v62 = vpop.eup %1565  ;;  %v1018_v4 = vmul.f32 %v2336_v45, %v2120_v23 }
 0x391   : > { %1085 = vmatpush.bf16.msra.mxu1 %v1060_v19  ;;  %v2351_v34 = vpop.eup %1567  ;;  %v1016_v31 = vmul.f32 %v2342_v62, %v2100_v35 }
 0x392   : > { %v2353_v6 = vpop.eup %1569  ;;  %v1056_v36 = vpack.c.bf16 %v1020_v15, %v1018_v4  ;;  %v1014_v23 = vmul.f32 %v2351_v34, %v2086_v5 }
 0x393   : > { %v849_v57 = vpop.xlane.xlu1 %848 }
 0x394   : > { %1575 = vrcp.f32 %v849_v57  ;;  %v2357_v19 = vpop.eup %1571 }
 0x395   : > { %v894_v49 = vpop.xlane.xlu2 %893  ;;  %1086 = vmatpush.bf16.msra.mxu1 %v1058_v20  ;;  %1577 = vrcp.f32 %v903_v25  ;;  %v2359_v41 = vpop.eup %1573  ;;  %v1054_v25 = vpack.c.bf16 %v1016_v31, %v1014_v23  ;;  %v970_v57 = vmul.f32 %v2357_v19, %v2228_v48 }
 0x396   : > { %1579 = vrcp.f32 %v900_v3  ;;  %v1012_v3 = vmul.f32 %v2353_v6, %v2090_v60 }
 0x397   : > { %1581 = vrcp.f32 %v843_v9 }
 0x398   : > { %1583 = vrcp.f32 %v894_v49  ;;  %v1010_v49 = vmul.f32 %v2359_v41, %v2074_v59 }
 0x399   : > { %1087 = vmatpush.bf16.msra.mxu1 %v1056_v36  ;;  %v2545_v36 = vld [vmem:[#allocation22_spill] sm:$0xff] }
 0x39a   : > { %v2363_v58 = vpop.eup %1575  ;;  %v1052_v48 = vpack.c.bf16 %v1012_v3, %v1010_v49 }
 0x39b   : > { %v897_v20 = vpop.xlane.xlu1 %896  ;;  %v972_v35 = vmul.f32 %v2363_v58, %v2246_v8  ;;  %v2371_v15 = vpop.eup %1577 }
 0x39c   : > { %1585 = vrcp.f32 %v897_v20  ;;  %v2375_v4 = vpop.eup %1579  ;;  %v1008_v8 = vmul.f32 %v2371_v15, %v2220_v32 }
 0x39d   : > { %v840_v13 = vpop.xlane.xlu2 %839  ;;  %1088 = vmatpush.bf16.msra.mxu1 %v1054_v25  ;;  %v1032_v5 = vpack.c.bf16 %v972_v35, %v970_v57  ;;  %v2377_v9 = vpop.eup %1581  ;;  %v1006_v31 = vmul.f32 %v2375_v4, %v2545_v36 }
 0x39e   : > { %1587 = vrcp.f32 %v840_v13  ;;  %v2381_v60 = vpop.eup %1583  ;;  %v2546_v13 = vld [vmem:[#allocation13_spill] sm:$0xff] }
 0x39f   : > { %1078 = vmatpush.bf16.msra.mxu0 %v1032_v5  ;;  %v1050_v25 = vpack.c.bf16 %v1008_v8, %v1006_v31  ;;  %v1002_v59 = vmul.f32 %v2381_v60, %v2260_v43  ;;  %v968_v5 = vmul.f32 %v2377_v9, %v2546_v13  ;;  %v2547_v43 = vpack.c.bf16 %v2254_v50, %v2250_v44 }
 0x3a0   : > { %v1027_v31 = vmul.f32 %v2324_v11, %v2206_v12  ;;  %v1025_v50 = vmul.f32 %v2320_v42, %v2162_v61  ;;  %v2549_v12 = vpack.c.bf16 %v2148_v1, %v2144_v14  ;;  %v1019_v61 = vmul.f32 %v2336_v45, %v2122_v56 }
 0x3a1   : > { %1089 = vmatpush.bf16.msra.mxu1 %v1052_v48  ;;  %v1017_v1 = vmul.f32 %v2342_v62, %v2102_v18  ;;  %v2555_v56 = vpack.c.bf16 %v2224_v2, %v2218_v21  ;;  %v2556_v18 = vld [vmem:[#allocation26_spill] sm:$0xff]  ;;  %v2558_v2 = vld [vmem:[#allocation23_spill] sm:$0xff] }
 0x3a2   : > { %v1586_v23 = vpop.eup %1585 }
 0x3a3   : > { %v888_v20 = vpop.xlane.xlu1 %887  ;;  %v1004_v57 = vmul.f32 %v1586_v23, %v2282_v38 }
 0x3a4   : > { %v1588_v35 = vpop.eup %1587  ;;  %1589 = vrcp.f32 %v888_v20  ;;  %v2548_v20 = vpack.c.bf16 %v2178_v37, %v2174_v55  ;;  %v1021_v55 = vmul.f32 %v2332_v27, %v2134_v17  ;;  %v2550_v37 = vpack.c.bf16 %v2118_v24, %v2110_v33  ;;  %v2554_v24 = vld [vmem:[#allocation28_spill] sm:$0xff] }
 0x3a5   : > { %v891_v3 = vpop.xlane.xlu2 %890  ;;  %1090 = vmatpush.bf16.msra.mxu1 %v1050_v25  ;;  %v966_v32 = vmul.f32 %v1588_v35, %v2288_v47  ;;  %v1048_v49 = vpack.c.bf16 %v1004_v57, %v1002_v59  ;;  %v1029_v47 = vmul.f32 %v2318_v22, %v2196_v52  ;;  %v1023_v52 = vmul.f32 %v2328_v53, %v2156_v16  ;;  %v2551_v16 = vld [vmem:[#allocation25_spill] sm:$0xff]  ;;  %v2553_v22 = vld [vmem:[#allocation27_spill] sm:$0xff] }
 0x3a6   : > { %1591 = vrcp.f32 %v891_v3  ;;  %v1057_v14 = vpack.c.bf16 %v1021_v55, %v1019_v61  ;;  %v1015_v17 = vmul.f32 %v2351_v34, %v2553_v22  ;;  %v973_v33 = vmul.f32 %v2363_v58, %v2256_v39  ;;  %v2557_v34 = vld [vmem:[#allocation14_spill] sm:$0xff]  ;;  %v1140_v57 = vld.sshfl [vmem:[#allocation1 + $0x8] sm:$0xff pattern:$0x75316420] }
 0x3a7   : > { %v1030_v48 = vpack.c.bf16 %v968_v5, %v966_v32  ;;  %v1061_v44 = vpack.c.bf16 %v1029_v47, %v1027_v31  ;;  %v1013_v11 = vmul.f32 %v2353_v6, %v2554_v24  ;;  %v1011_v53 = vmul.f32 %v2359_v41, %v2556_v18  ;;  %v1139_v41 = vld.sshfl [vmem:[#allocation1] sm:$0xff pattern:$0x75316420] }
 0x3a8   : > { %v1055_v42 = vpack.c.bf16 %v1017_v1, %v1015_v17  ;;  %v967_v62 = vmul.f32 %v1588_v35, %v2290_v7  ;;  %v1009_v39 = vmul.f32 %v2371_v15, %v2226_v30  ;;  %v969_v21 = vmul.f32 %v2377_v9, %v2557_v34 }
 0x3a9   : > { %1079 = vmatpush.bf16.msra.mxu0 %v1030_v48  ;;  %1091 = vmatpush.bf16.msra.mxu1 %v1048_v49  ;;  %v1053_v45 = vpack.c.bf16 %v1013_v11, %v1011_v53  ;;  %v1007_v6 = vmul.f32 %v2375_v4, %v2558_v2  ;;  %v1003_v30 = vmul.f32 %v2381_v60, %v2266_v51 }
 0x3aa   : > { %v1590_v8 = vpop.eup %1589  ;;  %v1031_v58 = vpack.c.bf16 %v969_v21, %v967_v62 }
 0x3ab   : > { %v998_v38 = vmul.f32 %v1590_v8, %v2296_v63  ;;  %v1059_v63 = vpack.c.bf16 %v1025_v50, %v1023_v52  ;;  %v999_v15 = vmul.f32 %v1590_v8, %v2301_v40 }
 0x3ac   : > { %v1592_v36 = vpop.eup %1591  ;;  %1080 = vmatmul.bf16.vlgmr.msra.gmra.mxu0 %v2340_v10 }
 0x3ad   : > { %1098 = vmatpush.bf16.msrb.mxu0 %v2547_v43  ;;  %v1000_v25 = vmul.f32 %v1592_v36, %v2303_v28  ;;  %v2552_v28 = vpack.c.bf16 %v2070_v26, %v2551_v16  ;;  %v971_v26 = vmul.f32 %v2357_v19, %v2234_v54  ;;  %v1051_v54 = vpack.c.bf16 %v1009_v39, %v1007_v6 }
 0x3ae   : > { %v1005_v19 = vmul.f32 %v1586_v23, %v2286_v46  ;;  %v1001_v9 = vmul.f32 %v1592_v36, %v2309_v0  ;;  %v1134_v46 = vld [vmem:[%s1668_s22] sm:$0xff]  ;;  %v1135_v23 = vld [vmem:[%s1668_s22 + $0x8] sm:$0xff] }
 0x3af   : > { %v1046_v59 = vpack.c.bf16 %v1000_v25, %v998_v38  ;;  %v1033_v27 = vpack.c.bf16 %v973_v33, %v971_v26 }
 0x3b0   : > { %v1049_v7 = vpack.c.bf16 %v1005_v19, %v1003_v30  ;;  %v1047_v4 = vpack.c.bf16 %v1001_v9, %v999_v15 }
 0x3b1   : > { %1099 = vmatpush.bf16.msrb.mxu0 %v2548_v20  ;;  %1092 = vmatpush.bf16.msra.mxu1 %v1046_v59  ;;  %v1183_v20 = vld [vmem:[%s2476_s2] sm:$0xff] }
 0x3b4   : > { %1093 = vmatmul.bf16.vlgmr.msra.gmra.mxu1 %v2344_v29 }
 0x3b5   : > { %1100 = vmatpush.bf16.msrb.mxu0 %v2549_v12  ;;  %1111 = vmatpush.bf16.msrb.mxu1 %v1061_v44 }
 0x3b9   : > { %1101 = vmatpush.bf16.msrb.mxu0 %v2550_v37  ;;  %1112 = vmatpush.bf16.msrb.mxu1 %v1059_v63 }
 0x3bd   : > { %1102 = vmatpush.bf16.msrb.mxu0 %v2552_v28  ;;  %1113 = vmatpush.bf16.msrb.mxu1 %v1057_v14 }
 0x3c1   : > { %1103 = vmatpush.bf16.msrb.mxu0 %v2555_v56  ;;  %1114 = vmatpush.bf16.msrb.mxu1 %v1055_v42 }
 0x3c5   : > { %1104 = vmatpush.bf16.msrb.mxu0 %v1033_v27  ;;  %1115 = vmatpush.bf16.msrb.mxu1 %v1053_v45 }
 0x3c9   : > { %1105 = vmatpush.bf16.msrb.mxu0 %v1031_v58  ;;  %1116 = vmatpush.bf16.msrb.mxu1 %v1051_v54 }
 0x3cc   : > { %1106 = vmatmul.bf16.vlgmr.msrb.gmra.mxu0 %v2340_v10 }
 0x3cd   : > { %1158 = vmatpush.xpose.msra.mxu0 %v1139_v41  ;;  %1117 = vmatpush.bf16.msrb.mxu1 %v1049_v7 }
 0x3d1   : > { %1118 = vmatpush.bf16.msrb.mxu1 %v1047_v4 }
 0x3d4   : > { %1119 = vmatmul.bf16.vlgmr.msrb.gmra.mxu1 %v2344_v29 }
 0x3d5   : > { %1178 = vmatpush.xpose.msra.mxu1 %v1140_v57 }
 0x3dc   : > { %1159 = vmatmul.f32.vlgmr.msra.gmra.mxu0 %v1134_v46 }
 0x3e4   : > { %1179 = vmatmul.f32.vlgmr.msra.gmra.mxu1 %v1135_v23 }
 0x429   : > { %v1081_v51 = vpop.f32.mrf.mxu0 }
 0x431   : > { %v1083_v60 = vpop.f32.mrf.mxu0  ;;  %v1094_v35 = vpop.f32.mrf.mxu1 }
 0x432   : > { %v1095_v10 = vadd.f32 %v1094_v35, %v1081_v51 }
 0x439   : > { %v1096_v3 = vpop.f32.mrf.mxu1 }
 0x449   : > { %v1107_v40 = vpop.f32.mrf.mxu0 }
 0x451   : > { %v1109_v32 = vpop.f32.mrf.mxu0  ;;  %v1120_v0 = vpop.f32.mrf.mxu1 }
 0x452   : > { %v1121_v13 = vadd.f32 %v1120_v0, %v1107_v40 }
 0x454   : > { %v1126_v5 = vrot.slane %v1121_v13, 4 }
 0x456   : > { %v1127_v49 = vsel %vm230_vm0, %v1095_v10, %v1126_v5 }
 0x457   : > { %1211 = vst [vmem:[#allocation1] ss:$2 sm:$0xff] %v1127_v49 }
 0x459   : > { %v1122_v48 = vpop.f32.mrf.mxu1  ;;  %v1160_v43 = vpop.f32.mrf.mxu0 }
 0x45e   : > { %v1212_v8 = vld.sshfl [vmem:[#allocation1] sm:$0xff pattern:$0x75316420]  ;;  %v1213_v29 = vld.sshfl [vmem:[#allocation1 + $0x8] sm:$0xff pattern:$0x75316420] }
 0x45f   : > { %v1216_v38 = vpack.c.bf16 %v1212_v8, %v1212_v8  ;;  %v1217_v36 = vpack.c.bf16 %v1213_v29, %v1213_v29 }
 0x461   : > { %v1180_v31 = vpop.f32.mrf.mxu1  ;;  %v1224_v47 = vsel %vm266_vm2, %v1216_v38, 0  ;;  %v1227_v59 = vsel %vm266_vm2, %v1217_v36, 0 }
 0x462   : > { %v1181_v25 = vadd.f32 %v1180_v31, %v1160_v43  ;;  %1236 = vmatpush.bf16.msrb.mxu1 %v1224_v47 }
 0x464   : > { %1202 = vmatpush.msrb.mxu0 %v1181_v25 }
 0x465   : > { %1367 = vmatmul.msk.f32.vlgmr.msrb.gmra.mxu0 %vm226_vm1, %v1183_v20 }
 0x466   : > { %1249 = vmatpush.bf16.msra.mxu0 %v1227_v59 }
 0x4e2   : > { %v1204_v44 = vpop.f32.mrf.mxu0 }
 0x4e3   : > { %v1207_v50 = vmax.f32 %v1204_v44, 0.0 }
 0x4e5   : > { %v1208_v12 = vpack.c.bf16 %v1207_v50, %v1207_v50 }
 0x4e7   : > { %1368 = vmatmul.msk.bf16.vlgmr.msrb.gmra.mxu1 %vm1218_vm3, %v1208_v12  ;;  %1369 = vmatmul.msk.bf16.vlgmr.msra.gmra.mxu0 %vm1218_vm3, %v1208_v12 }
 0x564   : > { %v1238_v52 = vpop.f32.mrf.mxu1  ;;  %v1251_v63 = vpop.f32.mrf.mxu0 }
 0x565   : > { %v1239_v55 = vadd.f32 %v1238_v52, %v1134_v46  ;;  %v1252_v37 = vadd.f32 %v1251_v63, %v1135_v23 }
 0x567   : > { %1255 = vst [vmem:[%s209_s5] sm:$0xff] %v1239_v55 }
 0x568   : > { %1256 = vst [vmem:[%s209_s5 + $0x8] sm:$0xff] %v1252_v37 }
 0x56c   : > { %v1240_v61 = vpop.f32.mrf.mxu1  ;;  %v1253_v14 = vpop.f32.mrf.mxu0 }
 0x56d PF: > { %s14_s17 = sadd.s32 1, %s1615_s17   ;;  %s2559_s15 = smov %s1611_s16 }
 0x56e   : > { %p11_p5 = scmp.ge.s32.totalorder %s14_s17, 4   ;;  %s2560_s16 = smov %s2562_s18 }
 0x570   :  { %13 = sbr.rel (!%p11_p5) target bundleno = 2 (0x2), region = 76 }

</bundles_post_ra>
